<compile_context>
chip_gen: v7x
topology: tpu7x:2x2x1
jax: 0.10.0
libtpu: 0.0.40
codegen_flags: <defaults>
</compile_context>

<pallas_src>
import jax
import jax.numpy as jnp
from jax.experimental import pallas as pl
from jax.experimental.pallas import tpu as pltpu


# -----------------------------------------------------------------------------
# In-kernel building blocks
# -----------------------------------------------------------------------------
def _leaky(a):
    # LeakyReLU(0.2):  max(a, 0.2*a)
    return jnp.maximum(a, 0.2 * a)


def _pad_into(scr_ref, y_hwc):
    """Zero the (h+2, w+2, c) VMEM scratch and write y into its interior."""
    h, w, _ = y_hwc.shape
    scr_ref[...] = jnp.zeros(scr_ref.shape, scr_ref.dtype)
    scr_ref[1:h + 1, 1:w + 1, :] = y_hwc


def _conv3x3_s1(xp, w_ref, h, w, c_out):
    """3x3 stride-1 'valid' cross-correlation on padded value xp=(h+2, w+2, cin).

    w_ref: (9, cin, cout) tap-major weights, tap = di*3 + dj."""
    c_in = xp.shape[-1]
    acc = jnp.zeros((h * w, c_out), jnp.float32)
    for di in range(3):
        for dj in range(3):
            patch = xp[di:di + h, dj:dj + w, :].reshape(h * w, c_in)
            acc += jnp.dot(patch, w_ref[di * 3 + dj],
                           preferred_element_type=jnp.float32)
    return acc


def _conv3x3_s2(ph, w_ref, ho, wo, c_out):
    """3x3 stride-2 conv from the polyphase view ph=(4, hh, wh, cin) where
    ph[2*p + q, i, j, :] == xpad[2*i + p, 2*j + q, :] (xpad = pad-1 input)."""
    c_in = ph.shape[-1]
    acc = jnp.zeros((ho * wo, c_out), jnp.float32)
    for di in range(3):
        for dj in range(3):
            a, p = divmod(di, 2)            # di = 2*a + p
            b, q = divmod(dj, 2)            # dj = 2*b + q
            patch = ph[2 * p + q, a:a + ho, b:b + wo, :].reshape(ho * wo, c_in)
            acc += jnp.dot(patch, w_ref[di * 3 + dj],
                           preferred_element_type=jnp.float32)
    return acc


# -----------------------------------------------------------------------------
# Stage A: L1 (conv 3->32, s1) + LeakyReLU
# -----------------------------------------------------------------------------
def _stage_a_kernel(x_ref, w1_ref, b1_ref, y_ref, xpad_scr):
    _, h, w, _ = x_ref.shape
    c1 = y_ref.shape[-1]
    _pad_into(xpad_scr, x_ref[0])
    a1 = _leaky(_conv3x3_s1(xpad_scr[...], w1_ref, h, w, c1) + b1_ref[...])
    y_ref[...] = a1.reshape(1, h, w, c1).astype(y_ref.dtype)


def _call_stage_a(x, w1, b1):
    n, h, w, c_in = x.shape
    c1 = w1.shape[-1]
    return pl.pallas_call(
        _stage_a_kernel,
        out_shape=jax.ShapeDtypeStruct((n, h, w, c1), jnp.float32),
        grid=(n,),
        in_specs=[
            pl.BlockSpec((1, h, w, c_in), lambda b: (b, 0, 0, 0)),
            pl.BlockSpec(w1.shape, lambda b: (0, 0, 0)),
            pl.BlockSpec(b1.shape, lambda b: (0, 0)),
        ],
        out_specs=pl.BlockSpec((1, h, w, c1), lambda b: (b, 0, 0, 0)),
        scratch_shapes=[pltpu.VMEM((h + 2, w + 2, c_in), jnp.float32)],
        compiler_params=pltpu.CompilerParams(dimension_semantics=("parallel",)),
    )(x, w1, b1)


# -----------------------------------------------------------------------------
# Stage B: L2 (conv 32->64, s2) + LReLU + L3 (conv 64->128) + BN + LReLU
# -----------------------------------------------------------------------------
def _stage_b_kernel(ph_ref, w2_ref, b2_ref, w3_ref, s3_ref, t3_ref,
                    y_ref, pad_scr):
    _, ho, wo, c3 = y_ref.shape
    c2 = w2_ref.shape[-1]
    a2 = _leaky(_conv3x3_s2(ph_ref[0], w2_ref, ho, wo, c2) + b2_ref[...])
    _pad_into(pad_scr, a2.reshape(ho, wo, c2))
    a3 = _conv3x3_s1(pad_scr[...], w3_ref, ho, wo, c3)
    a3 = _leaky(a3 * s3_ref[...] + t3_ref[...])
    y_ref[...] = a3.reshape(1, ho, wo, c3).astype(y_ref.dtype)


def _call_stage_b(ph, w2, b2, w3, s3, t3, ho, wo):
    n = ph.shape[0]
    c2 = w2.shape[-1]
    c3 = w3.shape[-1]
    return pl.pallas_call(
        _stage_b_kernel,
        out_shape=jax.ShapeDtypeStruct((n, ho, wo, c3), jnp.float32),
        grid=(n,),
        in_specs=[
            pl.BlockSpec((1,) + ph.shape[1:], lambda b: (b, 0, 0, 0, 0)),
            pl.BlockSpec(w2.shape, lambda b: (0, 0, 0)),
            pl.BlockSpec(b2.shape, lambda b: (0, 0)),
            pl.BlockSpec(w3.shape, lambda b: (0, 0, 0)),
            pl.BlockSpec(s3.shape, lambda b: (0, 0)),
            pl.BlockSpec(t3.shape, lambda b: (0, 0)),
        ],
        out_specs=pl.BlockSpec((1, ho, wo, c3), lambda b: (b, 0, 0, 0)),
        scratch_shapes=[pltpu.VMEM((ho + 2, wo + 2, c2), jnp.float32)],
        compiler_params=pltpu.CompilerParams(dimension_semantics=("parallel",)),
    )(ph, w2, b2, w3, s3, t3)


# -----------------------------------------------------------------------------
# Stage C: L4 (s2) + LReLU + L5 + BN + LReLU + L6 + BN + LReLU + L7
# -----------------------------------------------------------------------------
def _stage_c_kernel(ph_ref, w4_ref, b4_ref, w5_ref, s5_ref, t5_ref,
                    w6_ref, s6_ref, t6_ref, w7_ref, b7_ref,
                    o_ref, pad4_scr, pad5_scr, pad6_scr):
    ho = pad4_scr.shape[0] - 2
    wo = pad4_scr.shape[1] - 2
    c4 = w4_ref.shape[-1]
    c5 = w5_ref.shape[-1]
    c6 = w6_ref.shape[-1]

    a4 = _leaky(_conv3x3_s2(ph_ref[0], w4_ref, ho, wo, c4) + b4_ref[...])

    _pad_into(pad4_scr, a4.reshape(ho, wo, c4))
    a5 = _conv3x3_s1(pad4_scr[...], w5_ref, ho, wo, c5)
    a5 = _leaky(a5 * s5_ref[...] + t5_ref[...])

    _pad_into(pad5_scr, a5.reshape(ho, wo, c5))
    a6 = _conv3x3_s1(pad5_scr[...], w6_ref, ho, wo, c6)
    a6 = _leaky(a6 * s6_ref[...] + t6_ref[...])

    _pad_into(pad6_scr, a6.reshape(ho, wo, c6))
    a7 = _conv3x3_s1(pad6_scr[...], w7_ref, ho, wo, 1) + b7_ref[...]
    o_ref[...] = a7.reshape(1, ho * wo, 1).astype(o_ref.dtype)


def _call_stage_c(ph, w4, b4, w5, s5, t5, w6, s6, t6, w7, b7, ho, wo):
    n = ph.shape[0]
    c4 = w4.shape[-1]
    c5 = w5.shape[-1]
    c6 = w6.shape[-1]
    return pl.pallas_call(
        _stage_c_kernel,
        out_shape=jax.ShapeDtypeStruct((n, ho * wo, 1), jnp.float32),
        grid=(n,),
        in_specs=[
            pl.BlockSpec((1,) + ph.shape[1:], lambda b: (b, 0, 0, 0, 0)),
            pl.BlockSpec(w4.shape, lambda b: (0, 0, 0)),
            pl.BlockSpec(b4.shape, lambda b: (0, 0)),
            pl.BlockSpec(w5.shape, lambda b: (0, 0, 0)),
            pl.BlockSpec(s5.shape, lambda b: (0, 0)),
            pl.BlockSpec(t5.shape, lambda b: (0, 0)),
            pl.BlockSpec(w6.shape, lambda b: (0, 0, 0)),
            pl.BlockSpec(s6.shape, lambda b: (0, 0)),
            pl.BlockSpec(t6.shape, lambda b: (0, 0)),
            pl.BlockSpec(w7.shape, lambda b: (0, 0, 0)),
            pl.BlockSpec(b7.shape, lambda b: (0, 0)),
        ],
        out_specs=pl.BlockSpec((1, ho * wo, 1), lambda b: (b, 0, 0)),
        scratch_shapes=[
            pltpu.VMEM((ho + 2, wo + 2, c4), jnp.float32),
            pltpu.VMEM((ho + 2, wo + 2, c5), jnp.float32),
            pltpu.VMEM((ho + 2, wo + 2, c6), jnp.float32),
        ],
        compiler_params=pltpu.CompilerParams(dimension_semantics=("parallel",)),
    )(ph, w4, b4, w5, s5, t5, w6, s6, t6, w7, b7)


# -----------------------------------------------------------------------------
# Wrapper-level parameter preprocessing / polyphase helper
# -----------------------------------------------------------------------------
def _tapify(w_oihw):
    """torch Conv2d weight (Cout, Cin, 3, 3) -> tap-major (9, Cin, Cout)."""
    co, ci, _, _ = w_oihw.shape
    return jnp.transpose(w_oihw, (2, 3, 1, 0)).reshape(9, ci, co)


def _bn_fold(gamma, beta, mean, var, conv_bias=None, eps=1e-5):
    """Fold eval-mode BatchNorm (and optional conv bias) into scale/shift."""
    scale = gamma / jnp.sqrt(var + eps)
    b = jnp.zeros_like(mean) if conv_bias is None else conv_bias
    shift = beta + (b - mean) * scale
    return scale.reshape(1, -1), shift.reshape(1, -1)


def _space_to_depth_pad(y_nhwc):
    """pad=1 then split into the 4 stride-2 polyphases.

    Returns (N, 4, H/2+1, W/2+1, C) with index 2*p+q = xpad[:, p::2, q::2, :]."""
    yp = jnp.pad(y_nhwc, ((0, 0), (1, 1), (1, 1), (0, 0)))
    return jnp.stack([yp[:, p::2, q::2, :] for p in (0, 1) for q in (0, 1)],
                     axis=1)


# -----------------------------------------------------------------------------
# Full discriminator forward (NCHW in -> NCHW out, matching PyTorch)
# -----------------------------------------------------------------------------
def discriminator_forward(x_nchw, params):
    x = jnp.transpose(x_nchw, (0, 2, 3, 1)).astype(jnp.float32)   # NHWC
    n, h, w, _ = x.shape

    # ---- Stage A: L1 ---------------------------------------------------------
    w1 = _tapify(params["w1"]); b1 = params["b1"].reshape(1, -1)
    y1 = _call_stage_a(x, w1, b1)                                  # (N,H,W,32)

    # ---- Stage B: L2 (s2) + L3 + BN ------------------------------------------
    w2 = _tapify(params["w2"]); b2 = params["b2"].reshape(1, -1)
    w3 = _tapify(params["w3"])
    s3, t3 = _bn_fold(params["g3"], params["be3"], params["m3"], params["v3"])
    ph2 = _space_to_depth_pad(y1)                                  # (N,4,H/2+1,W/2+1,32)
    y3 = _call_stage_b(ph2, w2, b2, w3, s3, t3, h // 2, w // 2)    # (N,H/2,W/2,128)

    # ---- Stage C: L4 (s2) + L5 + BN + L6 + BN + L7 ---------------------------
    w4 = _tapify(params["w4"]); b4 = params["b4"].reshape(1, -1)
    w5 = _tapify(params["w5"])
    s5, t5 = _bn_fold(params["g5"], params["be5"], params["m5"], params["v5"])
    w6 = _tapify(params["w6"])
    s6, t6 = _bn_fold(params["g6"], params["be6"], params["m6"], params["v6"],
                      conv_bias=params["b6"])
    w7 = _tapify(params["w7"]); b7 = params["b7"].reshape(1, -1)
    ph4 = _space_to_depth_pad(y3)                                  # (N,4,H/4+1,W/4+1,128)
    o = _call_stage_c(ph4, w4, b4, w5, s5, t5, w6, s6, t6, w7, b7,
                      h // 4, w // 4)                              # (N, H/4*W/4, 1)

    return jnp.transpose(o.reshape(n, h // 4, w // 4, 1), (0, 3, 1, 2))


# -----------------------------------------------------------------------------
# Pure-JAX reference (independent codepath) for correctness checking
# -----------------------------------------------------------------------------
def reference_forward(x, params, eps=1e-5):
    def conv(x, w, stride, bias=None):
        y = jax.lax.conv_general_dilated(
            x, w, window_strides=(stride, stride), padding=((1, 1), (1, 1)),
            dimension_numbers=("NCHW", "OIHW", "NCHW"))
        if bias is not None:
            y = y + bias[None, :, None, None]
        return y

    def bn(x, g, b, m, v):
        return (g[None, :, None, None] * (x - m[None, :, None, None])
                * jax.lax.rsqrt(v[None, :, None, None] + eps)
                + b[None, :, None, None])

    def lrelu(x):
        return jnp.where(x > 0, x, 0.2 * x)

    y = lrelu(conv(x, params["w1"], 1, params["b1"]))
    y = lrelu(conv(y, params["w2"], 2, params["b2"]))
    y = lrelu(bn(conv(y, params["w3"], 1),
                 params["g3"], params["be3"], params["m3"], params["v3"]))
    y = lrelu(conv(y, params["w4"], 2, params["b4"]))
    y = lrelu(bn(conv(y, params["w5"], 1),
                 params["g5"], params["be5"], params["m5"], params["v5"]))
    y = lrelu(bn(conv(y, params["w6"], 1, params["b6"]),
                 params["g6"], params["be6"], params["m6"], params["v6"]))
    return conv(y, params["w7"], 1, params["b7"])


if __name__ == "__main__":
    key = jax.random.PRNGKey(0)
    N, H, W = 2, 16, 16

    keys = iter(jax.random.split(key, 32))

    def nrm(shape, scale):
        return jax.random.normal(next(keys), shape, jnp.float32) * scale

    params = {
        "w1": nrm((32, 3, 3, 3), 0.2),    "b1": nrm((32,), 0.1),
        "w2": nrm((64, 32, 3, 3), 0.06),  "b2": nrm((64,), 0.1),
        "w3": nrm((128, 64, 3, 3), 0.05),
        "g3": 1.0 + nrm((128,), 0.1), "be3": nrm((128,), 0.1),
        "m3": nrm((128,), 0.1),
        "v3": 0.5 + jax.random.uniform(next(keys), (128,), jnp.float32),
        "w4": nrm((128, 128, 3, 3), 0.03), "b4": nrm((128,), 0.1),
        "w5": nrm((256, 128, 3, 3), 0.03),
        "g5": 1.0 + nrm((256,), 0.1), "be5": nrm((256,), 0.1),
        "m5": nrm((256,), 0.1),
        "v5": 0.5 + jax.random.uniform(next(keys), (256,), jnp.float32),
        "w6": nrm((256, 256, 3, 3), 0.02), "b6": nrm((256,), 0.1),
        "g6": 1.0 + nrm((256,), 0.1), "be6": nrm((256,), 0.1),
        "m6": nrm((256,), 0.1),
        "v6": 0.5 + jax.random.uniform(next(keys), (256,), jnp.float32),
        "w7": nrm((1, 256, 3, 3), 0.02),  "b7": nrm((1,), 0.1),
    }
    x = jax.random.normal(next(keys), (N, 3, H, W), jnp.float32)

    out = jax.block_until_ready(discriminator_forward(x, params))
    assert out.shape == (N, 1, H // 4, W // 4), out.shape

    ref = jax.block_until_ready(reference_forward(x, params))
    if not jnp.allclose(out, ref, atol=1e-3, rtol=1e-3):
        err = float(jnp.max(jnp.abs(out - ref)))
        raise AssertionError(
            f"Pallas CartoonGANDiscriminator mismatch vs reference (max err {err})")

    print("KERNEL_OK")
</pallas_src>

<mosaic_0001>
module attributes {stable_mosaic.version = 11 : i64} {
  func.func @_stage_a_kernel(%arg0: i32, %arg1: memref<1x16x16x3xf32, #tpu.memory_space<vmem>>, %arg2: memref<9x3x32xf32, #tpu.memory_space<vmem>>, %arg3: memref<1x32xf32, #tpu.memory_space<vmem>>, %arg4: memref<1x16x16x32xf32, #tpu.memory_space<vmem>>, %arg5: memref<18x18x3xf32, #tpu.memory_space<vmem>>) attributes {dimension_semantics = [#tpu.dimension_semantics<parallel>], iteration_bounds = array<i64: 2>, scalar_prefetch = 0 : i64, scratch_operands = 1 : i64, tpu.core_type = #tpu.core_type<tc>, window_params = [{transform_indices = @transform_0, window_bounds = array<i64: 1, 16, 16, 3>}, {pipeline_mode = #tpu.pipeline_mode<synchronous>, transform_indices = @transform_1, window_bounds = array<i64: 9, 3, 32>}, {pipeline_mode = #tpu.pipeline_mode<synchronous>, transform_indices = @transform_2, window_bounds = array<i64: 1, 32>}, {transform_indices = @transform_3, window_bounds = array<i64: 1, 16, 16, 32>}]} {
    %c0 = arith.constant 0 : index
    %c0_0 = arith.constant 0 : index
    %c0_1 = arith.constant 0 : index
    %c0_2 = arith.constant 0 : index
    %0 = vector.load %arg1[%c0, %c0_0, %c0_1, %c0_2] : memref<1x16x16x3xf32, #tpu.memory_space<vmem>>, vector<1x16x16x3xf32>
    %1 = vector.shape_cast %0 : vector<1x16x16x3xf32> to vector<16x16x3xf32>
    %cst = arith.constant 0.000000e+00 : f32
    %2 = vector.broadcast %cst : f32 to vector<18x18x3xf32>
    %c0_3 = arith.constant 0 : index
    %c0_4 = arith.constant 0 : index
    %c0_5 = arith.constant 0 : index
    %3 = vector.load %arg5[%c0_3, %c0_4, %c0_5] : memref<18x18x3xf32, #tpu.memory_space<vmem>>, vector<18x18x3xf32>
    tpu.vector_store %arg5[%c0_3, %c0_4, %c0_5], %2 {strides = array<i32>} : memref<18x18x3xf32, #tpu.memory_space<vmem>>, vector<18x18x3xf32>,
    %c1 = arith.constant 1 : index
    %c1_6 = arith.constant 1 : index
    %c0_7 = arith.constant 0 : index
    %4 = vector.load %arg5[%c1, %c1_6, %c0_7] : memref<18x18x3xf32, #tpu.memory_space<vmem>>, vector<16x16x3xf32>
    tpu.vector_store %arg5[%c1, %c1_6, %c0_7], %1 {strides = array<i32>} : memref<18x18x3xf32, #tpu.memory_space<vmem>>, vector<16x16x3xf32>,
    %c0_8 = arith.constant 0 : index
    %c0_9 = arith.constant 0 : index
    %c0_10 = arith.constant 0 : index
    %5 = vector.load %arg5[%c0_8, %c0_9, %c0_10] : memref<18x18x3xf32, #tpu.memory_space<vmem>>, vector<18x18x3xf32>
    %cst_11 = arith.constant 0.000000e+00 : f32
    %6 = vector.broadcast %cst_11 : f32 to vector<256x32xf32>
    %7 = vector.extract_strided_slice %5 {offsets = [0, 0, 0], sizes = [16, 16, 3], strides = [1, 1, 1]} : vector<18x18x3xf32> to vector<16x16x3xf32>
    %8 = vector.shape_cast %7 : vector<16x16x3xf32> to vector<256x3xf32>
    %c0_12 = arith.constant 0 : index
    %c0_13 = arith.constant 0 : index
    %c0_14 = arith.constant 0 : index
    %9 = vector.load %arg2[%c0_12, %c0_13, %c0_14] : memref<9x3x32xf32, #tpu.memory_space<vmem>>, vector<1x3x32xf32>
    %10 = vector.shape_cast %9 : vector<1x3x32xf32> to vector<3x32xf32>
    %cst_15 = arith.constant dense<0.000000e+00> : vector<256x32xf32>
    %11 = tpu.matmul %8, %10, %cst_15 {dimension_numbers = #tpu.dot_dimension_numbers<[1], [0], [0], [1], [0, 0, 1, 1], [], []>} : vector<256x3xf32>, vector<3x32xf32>, vector<256x32xf32> -> vector<256x32xf32>
    %12 = arith.addf %6, %11 : vector<256x32xf32>
    %13 = vector.extract_strided_slice %5 {offsets = [0, 1, 0], sizes = [16, 16, 3], strides = [1, 1, 1]} : vector<18x18x3xf32> to vector<16x16x3xf32>
    %14 = vector.shape_cast %13 : vector<16x16x3xf32> to vector<256x3xf32>
    %c1_16 = arith.constant 1 : index
    %c0_17 = arith.constant 0 : index
    %c0_18 = arith.constant 0 : index
    %15 = vector.load %arg2[%c1_16, %c0_17, %c0_18] : memref<9x3x32xf32, #tpu.memory_space<vmem>>, vector<1x3x32xf32>
    %16 = vector.shape_cast %15 : vector<1x3x32xf32> to vector<3x32xf32>
    %cst_19 = arith.constant dense<0.000000e+00> : vector<256x32xf32>
    %17 = tpu.matmul %14, %16, %cst_19 {dimension_numbers = #tpu.dot_dimension_numbers<[1], [0], [0], [1], [0, 0, 1, 1], [], []>} : vector<256x3xf32>, vector<3x32xf32>, vector<256x32xf32> -> vector<256x32xf32>
    %18 = arith.addf %12, %17 : vector<256x32xf32>
    %19 = vector.extract_strided_slice %5 {offsets = [0, 2, 0], sizes = [16, 16, 3], strides = [1, 1, 1]} : vector<18x18x3xf32> to vector<16x16x3xf32>
    %20 = vector.shape_cast %19 : vector<16x16x3xf32> to vector<256x3xf32>
    %c2 = arith.constant 2 : index
    %c0_20 = arith.constant 0 : index
    %c0_21 = arith.constant 0 : index
    %21 = vector.load %arg2[%c2, %c0_20, %c0_21] : memref<9x3x32xf32, #tpu.memory_space<vmem>>, vector<1x3x32xf32>
    %22 = vector.shape_cast %21 : vector<1x3x32xf32> to vector<3x32xf32>
    %cst_22 = arith.constant dense<0.000000e+00> : vector<256x32xf32>
    %23 = tpu.matmul %20, %22, %cst_22 {dimension_numbers = #tpu.dot_dimension_numbers<[1], [0], [0], [1], [0, 0, 1, 1], [], []>} : vector<256x3xf32>, vector<3x32xf32>, vector<256x32xf32> -> vector<256x32xf32>
    %24 = arith.addf %18, %23 : vector<256x32xf32>
    %25 = vector.extract_strided_slice %5 {offsets = [1, 0, 0], sizes = [16, 16, 3], strides = [1, 1, 1]} : vector<18x18x3xf32> to vector<16x16x3xf32>
    %26 = vector.shape_cast %25 : vector<16x16x3xf32> to vector<256x3xf32>
    %c3 = arith.constant 3 : index
    %c0_23 = arith.constant 0 : index
    %c0_24 = arith.constant 0 : index
    %27 = vector.load %arg2[%c3, %c0_23, %c0_24] : memref<9x3x32xf32, #tpu.memory_space<vmem>>, vector<1x3x32xf32>
    %28 = vector.shape_cast %27 : vector<1x3x32xf32> to vector<3x32xf32>
    %cst_25 = arith.constant dense<0.000000e+00> : vector<256x32xf32>
    %29 = tpu.matmul %26, %28, %cst_25 {dimension_numbers = #tpu.dot_dimension_numbers<[1], [0], [0], [1], [0, 0, 1, 1], [], []>} : vector<256x3xf32>, vector<3x32xf32>, vector<256x32xf32> -> vector<256x32xf32>
    %30 = arith.addf %24, %29 : vector<256x32xf32>
    %31 = vector.extract_strided_slice %5 {offsets = [1, 1, 0], sizes = [16, 16, 3], strides = [1, 1, 1]} : vector<18x18x3xf32> to vector<16x16x3xf32>
    %32 = vector.shape_cast %31 : vector<16x16x3xf32> to vector<256x3xf32>
    %c4 = arith.constant 4 : index
    %c0_26 = arith.constant 0 : index
    %c0_27 = arith.constant 0 : index
    %33 = vector.load %arg2[%c4, %c0_26, %c0_27] : memref<9x3x32xf32, #tpu.memory_space<vmem>>, vector<1x3x32xf32>
    %34 = vector.shape_cast %33 : vector<1x3x32xf32> to vector<3x32xf32>
    %cst_28 = arith.constant dense<0.000000e+00> : vector<256x32xf32>
    %35 = tpu.matmul %32, %34, %cst_28 {dimension_numbers = #tpu.dot_dimension_numbers<[1], [0], [0], [1], [0, 0, 1, 1], [], []>} : vector<256x3xf32>, vector<3x32xf32>, vector<256x32xf32> -> vector<256x32xf32>
    %36 = arith.addf %30, %35 : vector<256x32xf32>
    %37 = vector.extract_strided_slice %5 {offsets = [1, 2, 0], sizes = [16, 16, 3], strides = [1, 1, 1]} : vector<18x18x3xf32> to vector<16x16x3xf32>
    %38 = vector.shape_cast %37 : vector<16x16x3xf32> to vector<256x3xf32>
    %c5 = arith.constant 5 : index
    %c0_29 = arith.constant 0 : index
    %c0_30 = arith.constant 0 : index
    %39 = vector.load %arg2[%c5, %c0_29, %c0_30] : memref<9x3x32xf32, #tpu.memory_space<vmem>>, vector<1x3x32xf32>
    %40 = vector.shape_cast %39 : vector<1x3x32xf32> to vector<3x32xf32>
    %cst_31 = arith.constant dense<0.000000e+00> : vector<256x32xf32>
    %41 = tpu.matmul %38, %40, %cst_31 {dimension_numbers = #tpu.dot_dimension_numbers<[1], [0], [0], [1], [0, 0, 1, 1], [], []>} : vector<256x3xf32>, vector<3x32xf32>, vector<256x32xf32> -> vector<256x32xf32>
    %42 = arith.addf %36, %41 : vector<256x32xf32>
    %43 = vector.extract_strided_slice %5 {offsets = [2, 0, 0], sizes = [16, 16, 3], strides = [1, 1, 1]} : vector<18x18x3xf32> to vector<16x16x3xf32>
    %44 = vector.shape_cast %43 : vector<16x16x3xf32> to vector<256x3xf32>
    %c6 = arith.constant 6 : index
    %c0_32 = arith.constant 0 : index
    %c0_33 = arith.constant 0 : index
    %45 = vector.load %arg2[%c6, %c0_32, %c0_33] : memref<9x3x32xf32, #tpu.memory_space<vmem>>, vector<1x3x32xf32>
    %46 = vector.shape_cast %45 : vector<1x3x32xf32> to vector<3x32xf32>
    %cst_34 = arith.constant dense<0.000000e+00> : vector<256x32xf32>
    %47 = tpu.matmul %44, %46, %cst_34 {dimension_numbers = #tpu.dot_dimension_numbers<[1], [0], [0], [1], [0, 0, 1, 1], [], []>} : vector<256x3xf32>, vector<3x32xf32>, vector<256x32xf32> -> vector<256x32xf32>
    %48 = arith.addf %42, %47 : vector<256x32xf32>
    %49 = vector.extract_strided_slice %5 {offsets = [2, 1, 0], sizes = [16, 16, 3], strides = [1, 1, 1]} : vector<18x18x3xf32> to vector<16x16x3xf32>
    %50 = vector.shape_cast %49 : vector<16x16x3xf32> to vector<256x3xf32>
    %c7 = arith.constant 7 : index
    %c0_35 = arith.constant 0 : index
    %c0_36 = arith.constant 0 : index
    %51 = vector.load %arg2[%c7, %c0_35, %c0_36] : memref<9x3x32xf32, #tpu.memory_space<vmem>>, vector<1x3x32xf32>
    %52 = vector.shape_cast %51 : vector<1x3x32xf32> to vector<3x32xf32>
    %cst_37 = arith.constant dense<0.000000e+00> : vector<256x32xf32>
    %53 = tpu.matmul %50, %52, %cst_37 {dimension_numbers = #tpu.dot_dimension_numbers<[1], [0], [0], [1], [0, 0, 1, 1], [], []>} : vector<256x3xf32>, vector<3x32xf32>, vector<256x32xf32> -> vector<256x32xf32>
    %54 = arith.addf %48, %53 : vector<256x32xf32>
    %55 = vector.extract_strided_slice %5 {offsets = [2, 2, 0], sizes = [16, 16, 3], strides = [1, 1, 1]} : vector<18x18x3xf32> to vector<16x16x3xf32>
    %56 = vector.shape_cast %55 : vector<16x16x3xf32> to vector<256x3xf32>
    %c8 = arith.constant 8 : index
    %c0_38 = arith.constant 0 : index
    %c0_39 = arith.constant 0 : index
    %57 = vector.load %arg2[%c8, %c0_38, %c0_39] : memref<9x3x32xf32, #tpu.memory_space<vmem>>, vector<1x3x32xf32>
    %58 = vector.shape_cast %57 : vector<1x3x32xf32> to vector<3x32xf32>
    %cst_40 = arith.constant dense<0.000000e+00> : vector<256x32xf32>
    %59 = tpu.matmul %56, %58, %cst_40 {dimension_numbers = #tpu.dot_dimension_numbers<[1], [0], [0], [1], [0, 0, 1, 1], [], []>} : vector<256x3xf32>, vector<3x32xf32>, vector<256x32xf32> -> vector<256x32xf32>
    %60 = arith.addf %54, %59 : vector<256x32xf32>
    %c0_41 = arith.constant 0 : index
    %c0_42 = arith.constant 0 : index
    %61 = vector.load %arg3[%c0_41, %c0_42] : memref<1x32xf32, #tpu.memory_space<vmem>>, vector<1x32xf32>
    %62 = vector.broadcast %61 : vector<1x32xf32> to vector<256x32xf32>
    %63 = arith.addf %60, %62 : vector<256x32xf32>
    %cst_43 = arith.constant 2.000000e-01 : f32
    %64 = vector.broadcast %cst_43 : f32 to vector<256x32xf32>
    %65 = arith.mulf %64, %63 : vector<256x32xf32>
    %66 = arith.maximumf %63, %65 : vector<256x32xf32>
    %67 = vector.shape_cast %66 : vector<256x32xf32> to vector<1x16x16x32xf32>
    %c0_44 = arith.constant 0 : index
    %c0_45 = arith.constant 0 : index
    %c0_46 = arith.constant 0 : index
    %c0_47 = arith.constant 0 : index
    %68 = vector.load %arg4[%c0_44, %c0_45, %c0_46, %c0_47] : memref<1x16x16x32xf32, #tpu.memory_space<vmem>>, vector<1x16x16x32xf32>
    tpu.vector_store %arg4[%c0_44, %c0_45, %c0_46, %c0_47], %67 {strides = array<i32>} : memref<1x16x16x32xf32, #tpu.memory_space<vmem>>, vector<1x16x16x32xf32>,
    return
  }
  func.func @transform_0(%arg0: i32) -> (i32, i32, i32, i32) {
    %c0_i32 = arith.constant 0 : i32
    %c0_i32_0 = arith.constant 0 : i32
    %c0_i32_1 = arith.constant 0 : i32
    %c0_i32_2 = arith.constant 0 : i32
    return %arg0, %c0_i32, %c0_i32_0, %c0_i32_1 : i32, i32, i32, i32
  }
  func.func @transform_1(%arg0: i32) -> (i32, i32, i32) {
    %c0_i32 = arith.constant 0 : i32
    %c0_i32_0 = arith.constant 0 : i32
    %c0_i32_1 = arith.constant 0 : i32
    %c0_i32_2 = arith.constant 0 : i32
    return %c0_i32, %c0_i32_0, %c0_i32_1 : i32, i32, i32
  }
  func.func @transform_2(%arg0: i32) -> (i32, i32) {
    %c0_i32 = arith.constant 0 : i32
    %c0_i32_0 = arith.constant 0 : i32
    %c0_i32_1 = arith.constant 0 : i32
    return %c0_i32, %c0_i32_0 : i32, i32
  }
  func.func @transform_3(%arg0: i32) -> (i32, i32, i32, i32) {
    %c0_i32 = arith.constant 0 : i32
    %c0_i32_0 = arith.constant 0 : i32
    %c0_i32_1 = arith.constant 0 : i32
    %c0_i32_2 = arith.constant 0 : i32
    return %arg0, %c0_i32, %c0_i32_0, %c0_i32_1 : i32, i32, i32, i32
  }
}

</mosaic_0001>

<bundles_post_ra>
// kernel: tpu_custom_call.1
= control target key start
LH: loop header
LB: loop body
LE: loop exit
PB: predicated region body
PF: predicated region fallthrough
CT: control target
= control target key end

     0   :  { %8 = vsyncpa [#allocation4], 0  ;;  %s6168_s0 = inlined_call_operand.vmem [shape: f32[2,16,16,3], index: 0, kind: input, shape index: {}]   ;;  %s6169_s1 = inlined_call_operand.vmem [shape: f32[9,3,32], index: 1, kind: input, shape index: {}]   ;;  %s6170_s2 = inlined_call_operand.vmem [shape: f32[1,32], index: 2, kind: input, shape index: {}]   ;;  %s6171_s3 = inlined_call_operand.hbm [shape: f32[2,16,16,32], index: 3, kind: output, shape index: {}]  }
   0x1   :  { %10 = vsyncpa [#allocation4 + $0x1], 0  ;;  %s4758_s12 = smov 0   ;;  %s4760_s13 = smov 0  }
   0x2   :  { %s4762_s14 = smov 0   ;;  %s4764_s15 = smov 0  }
   0x3 LB: > { %s4779_s16 = sadd.s32 4294967295, %s4732_s15   ;;  %s3302_s17 = sadd.s32 4294967294, %s4732_s15   ;;  %s4732_s15 = sphi %s4764_s15, %s6347_s15   ;;  %s4728_s14 = sphi %s4762_s14, %s6346_s14   ;;  %s4724_s13 = sphi %s4760_s13, %s6345_s13   ;;  %s4720_s12 = sphi %s4758_s12, %s6344_s12  }
   0x4   : > { %s4783_s18 = sadd.s32 1, %s4732_s15   ;;  %s91_s19 = sadd.s32 1, %s4728_s14 }
   0x5   : > { %s88_s20 = ssub.s32 %s4732_s15, %s4783_s18  ;;  %p101_p0 = scmp.ne.s32.totalorder %s4728_s14, %s4724_s13 }
   0x6   : > { %p89_p1 = scmp.eq.s32.totalorder %s88_s20, 0  ;;  %p102_p2 = scmp.eq.s32.totalorder %s4779_s16, 1 }
   0x7   : > { %p107_p3 = scmp.ne.s32.totalorder %s4724_s13, %s4720_s12  ;;  %p108_p4 = scmp.eq.s32.totalorder %s3302_s17, 1 }
   0x8   : > { %s4794_s21 = scalar_select %p89_p1, %s4728_s14, %s91_s19  }
   0x9   : > { %p4796_p5 = por %p102_p2, %p101_p0  ;;  %p4800_p6 = por %p108_p4, %p107_p3 }
   0xa   : > { %p3305_p7 = scmp.ge.s32.totalorder %s4732_s15, 1  ;;  %p140_p8 = scmp.lt.s32.totalorder %s4732_s15, 3 }
   0xc   : > { %p141_p9 = pnand %p3305_p7, %p140_p8 }
   0xe   : > { %144 = sbr.rel (%p141_p9) target bundleno = 581 (0x245), region = 32 }
  0x15   : > { %v3309_v0 = vld [vmem:[%s6169_s1 + $0x4] sm:$0x7]  ;;  %vm540_vm0 = vcmask 1042432   ;;  %vm201_vm1 = vcmask 23552   ;;  %v4734_v1 = vmov 0.0   ;;  %vm204_vm2 = vcmask 17408  }
  0x16   : > { %3919 = vmatprep.subr.msk.mxu1 %vm540_vm0, %v3309_v0  ;;  %202 = vst.msk [vmem:[#allocation2] sm:$0xff] %vm201_vm1, %v4734_v1  ;;  %203 = vst.msk [vmem:[#allocation2 + $0x8] sm:$0xff] %vm201_vm1, %v4734_v1  ;;  %v4849_v2 = vld [vmem:[%s6169_s1 + $0x10] sm:$0x7]  ;;  %p164_p10 = scmp.lt.s32.totalorder %s4779_s16, 1  ;;  %vm393_vm3 = vcmask 1046528  }
  0x17   : > { %206 = vst.msk [vmem:[#allocation2 + $0x18] sm:$0xff] %vm201_vm1, %v4734_v1  ;;  %207 = vst.msk [vmem:[#allocation2 + $0x20] sm:$0xff] %vm201_vm1, %v4734_v1  ;;  %v4855_v3 = vld [vmem:[%s6169_s1] sm:$0x7]  ;;  %3920 = vmatpush3.msk.msra.mxu1 %vm540_vm0, %v3309_v0  ;;  %4119 = vmatprep.subr.msk.mxu0 %vm540_vm0, %v4849_v2  ;;  %v4881_v4 = vld [vmem:[%s6169_s1 + $0x14] sm:$0x7] }
  0x18   : > { %209 = vst.msk [vmem:[#allocation2 + $0x30] sm:$0xff] %vm201_vm1, %v4734_v1  ;;  %210 = vst.msk [vmem:[#allocation2 + $0x38] sm:$0xff] %vm201_vm1, %v4734_v1  ;;  %4120 = vmatpush3.msk.msra.mxu0 %vm540_vm0, %v4849_v2  ;;  %s165_s5 = scalar_select %p164_p10, %s4779_s16, 1  ;;  %3969 = vmatprep.subr.msk.mxu1 %vm540_vm0, %v4855_v3  ;;  %v4924_v20 = vld [vmem:[%s6169_s1 + $0x8] sm:$0x7]  ;;  %vm1061_vm4 = vcmask 1045504  }
  0x19   : > { %212 = vst.msk [vmem:[#allocation2 + $0x48] sm:$0xff] %vm201_vm1, %v4734_v1  ;;  %213 = vst.msk [vmem:[#allocation2 + $0x50] sm:$0xff] %vm201_vm1, %v4734_v1  ;;  %4169 = vmatprep.subr.msk.mxu0 %vm540_vm0, %v4881_v4  ;;  %v5001_v57 = vld [vmem:[%s6169_s1 + $0x18] sm:$0x7]  ;;  %s161_s4 = sand.u32 1, %s4724_s13   ;;  %vm3193_vm5 = vcmask 261120  }
  0x1a   : > { %215 = vst.msk [vmem:[#allocation2 + $0x60] sm:$0xff] %vm201_vm1, %v4734_v1  ;;  %216 = vst.msk [vmem:[#allocation2 + $0x68] sm:$0xff] %vm201_vm1, %v4734_v1  ;;  %s3620_s6 = sshll.u32 %s165_s5, 8  ;;  %s3306_s7 = sshll.u32 %s161_s4, 8 }
  0x1b   : > { %218 = vst.msk [vmem:[#allocation2 + $0x78] sm:$0xff] %vm201_vm1, %v4734_v1  ;;  %219 = vst.msk [vmem:[#allocation2 + $0x80] sm:$0xff] %vm201_vm1, %v4734_v1  ;;  %s4895_s9 = scalar_lea.vmem %s6168_s0, %s3620_s6  ;;  %s6016_s8 = scalar_lea.vmem [#allocation3], %s3306_s7 }
  0x1c   : > { %221 = vst.msk [vmem:[#allocation2 + $0x90] sm:$0xff] %vm201_vm1, %v4734_v1  ;;  %222 = vst.msk [vmem:[#allocation2 + $0x98] sm:$0xff] %vm201_vm1, %v4734_v1  ;;  %v169_v5 = vld [vmem:[%s4895_s9] sm:$0xff]  ;;  %v170_v6 = vld [vmem:[%s4895_s9 + $0x8] sm:$0xff]  ;;  %s3240_s10 = sshll.u32 %s6016_s8, 4  ;;  %s4735_s24 = smov [#allocation3]   ;;  %s6119_s10 = int_to_ptr.vmem [resolvable:$true] %s3240_s10 }
  0x1d   : > { %224 = vst.msk [vmem:[#allocation2 + $0xa8] sm:$0xff] %vm201_vm1, %v4734_v1  ;;  %225 = vst.msk [vmem:[#allocation2 + $0xb0] sm:$0xff] %vm201_vm1, %v4734_v1  ;;  %v171_v7 = vld [vmem:[%s4895_s9 + $0x10] sm:$0xff]  ;;  %v4900_v8 = vld [vmem:[#allocation2] sm:$0xff]  ;;  %s4670_s20 = scalar_lea.vmem %s6119_s10, 4096  ;;  %s4674_s25 = sshll.u32 %s4735_s24, 4  ;;  %s4675_s25 = int_to_ptr.vmem [resolvable:$false] %s4674_s25 }
  0x1e   : > { %227 = vst.msk [vmem:[#allocation2 + $0xc0] sm:$0xff] %vm201_vm1, %v4734_v1  ;;  %228 = vst.msk [vmem:[#allocation2 + $0xc8] sm:$0xff] %vm201_vm1, %v4734_v1  ;;  %v4902_v9 = vld [vmem:[#allocation2 + $0x8] sm:$0xff]  ;;  %v172_v10 = vld [vmem:[%s4895_s9 + $0x18] sm:$0xff]  ;;  %v394_v11 = vrot.slane %v4900_v8, 1  ;;  %p4671_p11 = scmp.ne.s32.totalorder %s6119_s10, %s4670_s20  ;;  %s4676_s26 = scalar_lea.vmem %s4675_s25, 8192 }
  0x1f   : > { %230 = vst.msk [vmem:[#allocation2 + $0xd8] sm:$0xff] %vm201_vm1, %v4734_v1  ;;  %231 = vst.msk [vmem:[#allocation2 + $0xe0] sm:$0xff] %vm201_vm1, %v4734_v1  ;;  %v395_v12 = vrot.slane %v4902_v9, 1  ;;  %v173_v14 = vld [vmem:[%s4895_s9 + $0x20] sm:$0xff]  ;;  %v174_v15 = vld [vmem:[%s4895_s9 + $0x28] sm:$0xff]  ;;  %p4677_p0 = scmp.lt.s32.totalorder %s6119_s10, %s4675_s25  ;;  %p4678_p1 = scmp.lt.s32.totalorder %s4676_s26, %s4670_s20 }
  0x20   : > { %233 = vst.msk [vmem:[#allocation2 + $0xf0] sm:$0xff] %vm201_vm1, %v4734_v1  ;;  %234 = vst.msk [vmem:[#allocation2 + $0xf8] sm:$0xff] %vm201_vm1, %v4734_v1  ;;  %v175_v17 = vld [vmem:[%s4895_s9 + $0x30] sm:$0xff]  ;;  %v176_v18 = vld [vmem:[%s4895_s9 + $0x38] sm:$0xff]  ;;  %p4672_p12 = pnand %p4671_p11, %p4796_p5 }
  0x21   : > { %236 = vst.msk [vmem:[#allocation2 + $0x108] sm:$0xff] %vm201_vm1, %v4734_v1  ;;  %237 = vst.msk [vmem:[#allocation2 + $0x110] sm:$0xff] %vm201_vm1, %v4734_v1  ;;  %v177_v19 = vld [vmem:[%s4895_s9 + $0x40] sm:$0xff]  ;;  %v396_v21 = vsel %vm393_vm3, %v394_v11, %v395_v12  ;;  %v178_v22 = vld [vmem:[%s4895_s9 + $0x48] sm:$0xff]  ;;  %p4679_p2 = por %p4678_p1, %p4677_p0 }
  0x22   : > { %239 = vst.msk [vmem:[#allocation2 + $0x120] sm:$0xff] %vm201_vm1, %v4734_v1  ;;  %240 = vst.msk [vmem:[#allocation2 + $0x128] sm:$0xff] %vm201_vm1, %v4734_v1  ;;  %v179_v23 = vld [vmem:[%s4895_s9 + $0x50] sm:$0xff]  ;;  %v180_v24 = vld [vmem:[%s4895_s9 + $0x58] sm:$0xff]  ;;  %3921 = vmatprep.mubr.msk.f32.mxu1 %vm201_vm1, %v396_v21  ;;  %p4673_p13 = pneg %p4672_p12 }
  0x23   : > { %242 = vst.msk [vmem:[#allocation2 + $0x138] sm:$0xff] %vm201_vm1, %v4734_v1  ;;  %243 = vst.msk [vmem:[#allocation2 + $0x140] sm:$0xff] %vm201_vm1, %v4734_v1  ;;  %v181_v26 = vld [vmem:[%s4895_s9 + $0x60] sm:$0xff]  ;;  %v182_v27 = vld [vmem:[%s4895_s9 + $0x68] sm:$0xff] }
  0x24   : > { %245 = vst.msk [vmem:[#allocation2 + $0x150] sm:$0xff] %vm201_vm1, %v4734_v1  ;;  %246 = vst.msk [vmem:[#allocation2 + $0x158] sm:$0xff] %vm201_vm1, %v4734_v1  ;;  %v183_v28 = vld [vmem:[%s4895_s9 + $0x70] sm:$0xff]  ;;  %v184_v29 = vld [vmem:[%s4895_s9 + $0x78] sm:$0xff]  ;;  %p4680_p3 = pnand %p4679_p2, %p4673_p13 }
  0x25   : > { %248 = vst.msk [vmem:[#allocation2 + $0x168] sm:$0xff] %vm201_vm1, %v4734_v1  ;;  %249 = vst.msk [vmem:[#allocation2 + $0x170] sm:$0xff] %vm201_vm1, %v4734_v1  ;;  %v185_v30 = vld [vmem:[%s4895_s9 + $0x80] sm:$0xff]  ;;  %v186_v31 = vld [vmem:[%s4895_s9 + $0x88] sm:$0xff] }
  0x26   : > { %251 = vst.msk [vmem:[#allocation2 + $0x180] sm:$0xff] %vm201_vm1, %v4734_v1  ;;  %252 = vst.msk [vmem:[#allocation2 + $0x188] sm:$0xff] %vm201_vm1, %v4734_v1  ;;  %v187_v32 = vld [vmem:[%s4895_s9 + $0x90] sm:$0xff]  ;;  %v188_v33 = vld [vmem:[%s4895_s9 + $0x98] sm:$0xff] }
  0x27   : > { %254 = vst.msk [vmem:[#allocation2 + $0x198] sm:$0xff] %vm201_vm1, %v4734_v1  ;;  %255 = vst.msk [vmem:[#allocation2 + $0x1a0] sm:$0xff] %vm201_vm1, %v4734_v1  ;;  %v189_v34 = vld [vmem:[%s4895_s9 + $0xa0] sm:$0xff]  ;;  %v196_v21 = vld [vmem:[%s4895_s9 + $0xd8] sm:$0xff] }
  0x28   : > { %205 = vst.msk [vmem:[#allocation2 + $0x10] sm:$0x3] %vm204_vm2, %v4734_v1  ;;  %208 = vst.msk [vmem:[#allocation2 + $0x28] sm:$0x3] %vm204_vm2, %v4734_v1 }
  0x29   : > { %211 = vst.msk [vmem:[#allocation2 + $0x40] sm:$0x3] %vm204_vm2, %v4734_v1  ;;  %214 = vst.msk [vmem:[#allocation2 + $0x58] sm:$0x3] %vm204_vm2, %v4734_v1 }
  0x2a   : > { %217 = vst.msk [vmem:[#allocation2 + $0x70] sm:$0x3] %vm204_vm2, %v4734_v1  ;;  %220 = vst.msk [vmem:[#allocation2 + $0x88] sm:$0x3] %vm204_vm2, %v4734_v1 }
  0x2b   : > { %223 = vst.msk [vmem:[#allocation2 + $0xa0] sm:$0x3] %vm204_vm2, %v4734_v1  ;;  %226 = vst.msk [vmem:[#allocation2 + $0xb8] sm:$0x3] %vm204_vm2, %v4734_v1 }
  0x2c   : > { %229 = vst.msk [vmem:[#allocation2 + $0xd0] sm:$0x3] %vm204_vm2, %v4734_v1  ;;  %232 = vst.msk [vmem:[#allocation2 + $0xe8] sm:$0x3] %vm204_vm2, %v4734_v1 }
  0x2d   : > { %235 = vst.msk [vmem:[#allocation2 + $0x100] sm:$0x3] %vm204_vm2, %v4734_v1  ;;  %238 = vst.msk [vmem:[#allocation2 + $0x118] sm:$0x3] %vm204_vm2, %v4734_v1 }
  0x2e   : > { %241 = vst.msk [vmem:[#allocation2 + $0x130] sm:$0x3] %vm204_vm2, %v4734_v1  ;;  %244 = vst.msk [vmem:[#allocation2 + $0x148] sm:$0x3] %vm204_vm2, %v4734_v1 }
  0x2f   : > { %247 = vst.msk [vmem:[#allocation2 + $0x160] sm:$0x3] %vm204_vm2, %v4734_v1  ;;  %250 = vst.msk [vmem:[#allocation2 + $0x178] sm:$0x3] %vm204_vm2, %v4734_v1  ;;  %v4910_v13 = vld [vmem:[#allocation2 + $0x10] sm:$0x3] }
  0x30   : > { %253 = vst.msk [vmem:[#allocation2 + $0x190] sm:$0x3] %vm204_vm2, %v4734_v1  ;;  %256 = vst.msk [vmem:[#allocation2 + $0x1a8] sm:$0x3] %vm204_vm2, %v4734_v1  ;;  %v397_v16 = vrot.slane %v4910_v13, 1 }
  0x31   : > { %258 = vst.msk [vmem:[#allocation2 + $0x19] sm:$0xff] %vm201_vm1, %v169_v5  ;;  %259 = vst.msk [vmem:[#allocation2 + $0x21] sm:$0xff] %vm201_vm1, %v170_v6 }
  0x32   : > { %260 = vst.msk [vmem:[#allocation2 + $0x31] sm:$0xff] %vm201_vm1, %v171_v7  ;;  %261 = vst.msk [vmem:[#allocation2 + $0x39] sm:$0xff] %vm201_vm1, %v172_v10  ;;  %v398_v25 = vsel %vm393_vm3, %v395_v12, %v397_v16  ;;  %v192_v16 = vld [vmem:[%s4895_s9 + $0xb8] sm:$0xff] }
  0x33   : > { %262 = vst.msk [vmem:[#allocation2 + $0x49] sm:$0xff] %vm201_vm1, %v173_v14  ;;  %263 = vst.msk [vmem:[#allocation2 + $0x51] sm:$0xff] %vm201_vm1, %v174_v15  ;;  %3922 = vmatmul.mubr.msk.f32.vlgmr.msra.gmra.mrb[0].mxu1 %vm201_vm1, %v398_v25  ;;  %v190_v14 = vld [vmem:[%s4895_s9 + $0xa8] sm:$0xff]  ;;  %v191_v15 = vld [vmem:[%s4895_s9 + $0xb0] sm:$0xff] }
  0x34   : > { %264 = vst.msk [vmem:[#allocation2 + $0x61] sm:$0xff] %vm201_vm1, %v175_v17  ;;  %265 = vst.msk [vmem:[#allocation2 + $0x69] sm:$0xff] %vm201_vm1, %v176_v18  ;;  %3970 = vmatpush3.msk.msra.mxu1 %vm540_vm0, %v4855_v3  ;;  %v193_v17 = vld [vmem:[%s4895_s9 + $0xc0] sm:$0xff]  ;;  %v194_v18 = vld [vmem:[%s4895_s9 + $0xc8] sm:$0xff] }
  0x35   : > { %266 = vst.msk [vmem:[#allocation2 + $0x79] sm:$0xff] %vm201_vm1, %v177_v19  ;;  %267 = vst.msk [vmem:[#allocation2 + $0x81] sm:$0xff] %vm201_vm1, %v178_v22  ;;  %4019 = vmatprep.subr.msk.mxu1 %vm540_vm0, %v4924_v20  ;;  %v195_v19 = vld [vmem:[%s4895_s9 + $0xd0] sm:$0xff]  ;;  %v198_v25 = vld [vmem:[%s4895_s9 + $0xe8] sm:$0xff] }
  0x36   : > { %268 = vst.msk [vmem:[#allocation2 + $0x91] sm:$0xff] %vm201_vm1, %v179_v23  ;;  %269 = vst.msk [vmem:[#allocation2 + $0x99] sm:$0xff] %vm201_vm1, %v180_v24  ;;  %v197_v24 = vld [vmem:[%s4895_s9 + $0xe0] sm:$0xff] }
  0x37   : > { %270 = vst.msk [vmem:[#allocation2 + $0xa9] sm:$0xff] %vm201_vm1, %v181_v26  ;;  %271 = vst.msk [vmem:[#allocation2 + $0xb1] sm:$0xff] %vm201_vm1, %v182_v27  ;;  %v199_v26 = vld [vmem:[%s4895_s9 + $0xf0] sm:$0xff] }
  0x38   : > { %272 = vst.msk [vmem:[#allocation2 + $0xc1] sm:$0xff] %vm201_vm1, %v183_v28  ;;  %273 = vst.msk [vmem:[#allocation2 + $0xc9] sm:$0xff] %vm201_vm1, %v184_v29  ;;  %v4956_v35 = vld [vmem:[#allocation2 + $0x18] sm:$0xff]  ;;  %v4958_v36 = vld [vmem:[#allocation2 + $0x20] sm:$0xff] }
  0x39   : > { %274 = vst.msk [vmem:[#allocation2 + $0xd9] sm:$0xff] %vm201_vm1, %v185_v30  ;;  %275 = vst.msk [vmem:[#allocation2 + $0xe1] sm:$0xff] %vm201_vm1, %v186_v31  ;;  %v4960_v37 = vld [vmem:[#allocation2 + $0x28] sm:$0x3]  ;;  %v399_v38 = vrot.slane %v4956_v35, 1  ;;  %v400_v39 = vrot.slane %v4958_v36, 1 }
  0x3a   : > { %6246 = vst [vmem:[#allocation6_spill] sm:$0xff] %v4956_v35  ;;  %6247 = vst [vmem:[#allocation7_spill] sm:$0xff] %v4958_v36  ;;  %v402_v40 = vrot.slane %v4960_v37, 1  ;;  %v4970_v41 = vld [vmem:[#allocation2 + $0x30] sm:$0xff]  ;;  %v4972_v42 = vld [vmem:[#allocation2 + $0x38] sm:$0xff] }
  0x3b   : > { %276 = vst.msk [vmem:[#allocation2 + $0xf1] sm:$0xff] %vm201_vm1, %v187_v32  ;;  %277 = vst.msk [vmem:[#allocation2 + $0xf9] sm:$0xff] %vm201_vm1, %v188_v33  ;;  %v404_v43 = vrot.slane %v4970_v41, 1  ;;  %v405_v44 = vrot.slane %v4972_v42, 1  ;;  %v4976_v45 = vld [vmem:[#allocation2 + $0x40] sm:$0x3]  ;;  %v401_v48 = vsel %vm393_vm3, %v399_v38, %v400_v39 }
  0x3c   : > { %278 = vst.msk [vmem:[#allocation2 + $0x109] sm:$0xff] %vm201_vm1, %v189_v34  ;;  %v4978_v46 = vld [vmem:[#allocation2 + $0x48] sm:$0xff]  ;;  %v4980_v47 = vld [vmem:[#allocation2 + $0x50] sm:$0xff]  ;;  %v403_v49 = vsel %vm393_vm3, %v400_v39, %v402_v40  ;;  %v407_v50 = vrot.slane %v4976_v45, 1  ;;  %v4986_v52 = vld [vmem:[#allocation2 + $0x58] sm:$0x3]  ;;  %3924 = vmatprep.mubr.msk.f32.mxu1 %vm201_vm1, %v401_v48  ;;  %4121 = vmatprep.mubr.msk.f32.mxu0 %vm201_vm1, %v401_v48 }
  0x3d   : > { %v409_v51 = vrot.slane %v4978_v46, 1  ;;  %v4991_v53 = vsel %vm393_vm3, %v404_v43, %v405_v44  ;;  %v410_v54 = vrot.slane %v4980_v47, 1  ;;  %v4994_v55 = vld [vmem:[#allocation2 + $0x60] sm:$0xff]  ;;  %v4996_v56 = vld [vmem:[#allocation2 + $0x68] sm:$0xff]  ;;  %3925 = vmatmul.mubr.msk.f32.gmra.mrb[2].mxu1 %vm201_vm1, %v403_v49  ;;  %4122 = vmatmul.mubr.msk.f32.vlgmr.msra.gmra.mrb[0].mxu0 %vm201_vm1, %v403_v49  ;;  %v412_v59 = vrot.slane %v4986_v52, 1  ;;  %v5024_v0 = vld [vmem:[#allocation2 + $0x78] sm:$0xff] }
  0x3e   : > { %6248 = vst [vmem:[#allocation8_spill] sm:$0xff] %v4991_v53  ;;  %4170 = vmatpush3.msk.msra.mxu0 %vm540_vm0, %v4881_v4  ;;  %3927 = vmatprep.mubr.msk.f32.mxu1 %vm201_vm1, %v4991_v53  ;;  %v5010_v58 = vsel %vm393_vm3, %v405_v44, %v407_v50  ;;  %v414_v61 = vrot.slane %v4994_v55, 1  ;;  %v415_v62 = vrot.slane %v4996_v56, 1  ;;  %v5020_v63 = vld [vmem:[#allocation2 + $0x70] sm:$0x3]  ;;  %v5026_v1 = vld [vmem:[#allocation2 + $0x80] sm:$0xff] }
  0x3f   : > { %6249 = vst [vmem:[#allocation9_spill] sm:$0xff] %v5010_v58  ;;  %4124 = vmatprep.mubr.msk.f32.mxu0 %vm201_vm1, %v4991_v53  ;;  %v5016_v60 = vsel %vm393_vm3, %v409_v51, %v410_v54  ;;  %4219 = vmatprep.subr.msk.mxu0 %vm540_vm0, %v5001_v57  ;;  %v5037_v3 = vsel %vm393_vm3, %v410_v54, %v412_v59  ;;  %v417_v4 = vrot.slane %v5020_v63, 1  ;;  %v5040_v5 = vld [vmem:[#allocation2 + $0x88] sm:$0x3]  ;;  %v419_v7 = vrot.slane %v5024_v0, 1  ;;  %v5047_v11 = vld [vmem:[#allocation2 + $0x90] sm:$0xff] }
  0x40   : > { %6250 = vst [vmem:[#allocation10_spill] sm:$0xff] %v5016_v60  ;;  %6251 = vst [vmem:[#allocation11_spill] sm:$0xff] %v5037_v3  ;;  %v5043_v6 = vsel %vm393_vm3, %v414_v61, %v415_v62  ;;  %v420_v10 = vrot.slane %v5026_v1, 1  ;;  %v5049_v12 = vld [vmem:[#allocation2 + $0x98] sm:$0xff]  ;;  %v422_v23 = vrot.slane %v5040_v5, 1  ;;  %v424_v28 = vrot.slane %v5047_v11, 1 }
  0x41   : > { %3928 = vmatmul.mubr.msk.f32.gmra.mrb[4].mxu1 %vm201_vm1, %v5010_v58  ;;  %4125 = vmatmul.mubr.msk.f32.gmra.mrb[2].mxu0 %vm201_vm1, %v5010_v58  ;;  %6252 = vst [vmem:[#allocation12_spill] sm:$0xff] %v5043_v6  ;;  %279 = vst.msk [vmem:[#allocation2 + $0x111] sm:$0xff] %vm201_vm1, %v190_v14  ;;  %v5071_v22 = vsel %vm393_vm3, %v415_v62, %v417_v4  ;;  %v425_v29 = vrot.slane %v5049_v12, 1  ;;  %v5085_v30 = vld [vmem:[#allocation2 + $0xa0] sm:$0x3]  ;;  %v200_v31 = vld [vmem:[%s4895_s9 + $0xf8] sm:$0xff] }
  0x42   : > { %3930 = vmatprep.mubr.msk.f32.mxu1 %vm201_vm1, %v5016_v60  ;;  %4127 = vmatprep.mubr.msk.f32.mxu0 %vm201_vm1, %v5016_v60  ;;  %280 = vst.msk [vmem:[#allocation2 + $0x121] sm:$0xff] %vm201_vm1, %v191_v15  ;;  %281 = vst.msk [vmem:[#allocation2 + $0x129] sm:$0xff] %vm201_vm1, %v192_v16  ;;  %v5081_v27 = vsel %vm393_vm3, %v419_v7, %v420_v10  ;;  %v5091_v32 = vld [vmem:[#allocation2 + $0xa8] sm:$0xff]  ;;  %v5093_v33 = vld [vmem:[#allocation2 + $0xb0] sm:$0xff]  ;;  %v5105_v34 = vsel %vm393_vm3, %v420_v10, %v422_v23  ;;  %v427_v38 = vrot.slane %v5085_v30, 1  ;;  %s3621_s9 = sshll.u32 %s4779_s16, 12 }
  0x43   : > { %282 = vst.msk [vmem:[#allocation2 + $0x139] sm:$0xff] %vm201_vm1, %v193_v17  ;;  %6253 = vst [vmem:[#allocation13_spill] sm:$0xff] %v5071_v22  ;;  %v5109_v39 = vsel %vm393_vm3, %v424_v28, %v425_v29  ;;  %v429_v40 = vrot.slane %v5091_v32, 1  ;;  %v430_v43 = vrot.slane %v5093_v33, 1  ;;  %v5113_v44 = vld [vmem:[#allocation2 + $0xb8] sm:$0x3]  ;;  %s6117_s19 = scalar_lea.hbm %s6171_s3, %s3621_s9 }
  0x44   : > { %283 = vst.msk [vmem:[#allocation2 + $0x141] sm:$0xff] %vm201_vm1, %v194_v18  ;;  %284 = vst.msk [vmem:[#allocation2 + $0x151] sm:$0xff] %vm201_vm1, %v195_v19  ;;  %v5115_v48 = vld [vmem:[#allocation2 + $0xc0] sm:$0xff]  ;;  %v5117_v49 = vld [vmem:[#allocation2 + $0xc8] sm:$0xff]  ;;  %v5128_v50 = vsel %vm393_vm3, %v425_v29, %v427_v38  ;;  %v432_v51 = vrot.slane %v5113_v44, 1  ;;  %v1067_v19 = vrot.slane %v4956_v35, 2 }
  0x45   : > { %3931 = vmatmul.mubr.msk.f32.gmra.mrb[6].mxu1 %vm201_vm1, %v5037_v3  ;;  %4128 = vmatmul.mubr.msk.f32.gmra.mrb[4].mxu0 %vm201_vm1, %v5037_v3  ;;  %285 = vst.msk [vmem:[#allocation2 + $0x159] sm:$0xff] %vm201_vm1, %v196_v21  ;;  %6254 = vst [vmem:[#allocation14_spill] sm:$0xff] %v5081_v27  ;;  %v5132_v54 = vsel %vm393_vm3, %v429_v40, %v430_v43  ;;  %v434_v59 = vrot.slane %v5115_v48, 1  ;;  %v435_v61 = vrot.slane %v5117_v49, 1  ;;  %v5136_v62 = vld [vmem:[#allocation2 + $0xd0] sm:$0x3] }
  0x46   : > { %3933 = vmatprep.mubr.msk.f32.mxu1 %vm201_vm1, %v5043_v6  ;;  %4130 = vmatprep.mubr.msk.f32.mxu0 %vm201_vm1, %v5043_v6  ;;  %286 = vst.msk [vmem:[#allocation2 + $0x169] sm:$0xff] %vm201_vm1, %v197_v24  ;;  %287 = vst.msk [vmem:[#allocation2 + $0x171] sm:$0xff] %vm201_vm1, %v198_v25  ;;  %v5138_v4 = vld [vmem:[#allocation2 + $0xd8] sm:$0xff]  ;;  %v5140_v7 = vld [vmem:[#allocation2 + $0xe0] sm:$0xff]  ;;  %v5151_v10 = vsel %vm393_vm3, %v430_v43, %v432_v51  ;;  %v437_v14 = vrot.slane %v5136_v62, 1  ;;  %v1068_v21 = vrot.slane %v4958_v36, 2 }
  0x47   : > { %288 = vst.msk [vmem:[#allocation2 + $0x181] sm:$0xff] %vm201_vm1, %v199_v26  ;;  %289 = vst.msk [vmem:[#allocation2 + $0x189] sm:$0xff] %vm201_vm1, %v200_v31  ;;  %v439_v15 = vrot.slane %v5138_v4, 1  ;;  %v5155_v16 = vld [vmem:[#allocation2 + $0xf0] sm:$0xff]  ;;  %v5158_v17 = vsel %vm393_vm3, %v434_v59, %v435_v61  ;;  %v440_v18 = vrot.slane %v5140_v7, 1  ;;  %v5165_v24 = vld [vmem:[#allocation2 + $0xf8] sm:$0xff] }
  0x48   : > { %6255 = vst [vmem:[#allocation15_spill] sm:$0xff] %v5105_v34  ;;  %6256 = vst [vmem:[#allocation16_spill] sm:$0xff] %v5109_v39  ;;  %v5163_v23 = vld [vmem:[#allocation2 + $0xe8] sm:$0x3]  ;;  %v1070_v25 = vrot.slane %v4960_v37, 2  ;;  %v5177_v26 = vsel %vm393_vm3, %v435_v61, %v437_v14  ;;  %v444_v29 = vrot.slane %v5155_v16, 1  ;;  %v5188_v40 = vsel %vm1061_vm4, %v1067_v19, %v1068_v21 }
  0x49   : > { %3934 = vmatmul.mubr.msk.f32.gmra.mrb[8].mxu1 %vm201_vm1, %v5071_v22  ;;  %4131 = vmatmul.mubr.msk.f32.gmra.mrb[6].mxu0 %vm201_vm1, %v5071_v22  ;;  %6257 = vst [vmem:[#allocation17_spill] sm:$0xff] %v5128_v50  ;;  %6258 = vst [vmem:[#allocation18_spill] sm:$0xff] %v5132_v54  ;;  %v442_v28 = vrot.slane %v5163_v23, 1  ;;  %v445_v37 = vrot.slane %v5165_v24, 1  ;;  %v5182_v31 = vld [vmem:[#allocation2 + $0x100] sm:$0x3]  ;;  %v5185_v38 = vsel %vm393_vm3, %v439_v15, %v440_v18 }
  0x4a   : > { %3936 = vmatprep.mubr.msk.f32.mxu1 %vm201_vm1, %v5081_v27  ;;  %4133 = vmatprep.mubr.msk.f32.mxu0 %vm201_vm1, %v5081_v27  ;;  %6259 = vst [vmem:[#allocation19_spill] sm:$0xff] %v5151_v10  ;;  %6260 = vst [vmem:[#allocation20_spill] sm:$0xff] %v5158_v17  ;;  %v1072_v43 = vrot.slane %v4970_v41, 2  ;;  %v1073_v51 = vrot.slane %v4972_v42, 2  ;;  %v5192_v59 = vld [vmem:[#allocation2 + $0x108] sm:$0xff]  ;;  %v5194_v61 = vld [vmem:[#allocation2 + $0x110] sm:$0xff]  ;;  %v5209_v19 = vsel %vm1061_vm4, %v1068_v21, %v1070_v25 }
  0x4b   : > { %6261 = vst [vmem:[#allocation21_spill] sm:$0xff] %v5177_v26  ;;  %6262 = vst [vmem:[#allocation22_spill] sm:$0xff] %v5185_v38  ;;  %v447_v14 = vrot.slane %v5182_v31, 1  ;;  %v5206_v15 = vsel %vm393_vm3, %v440_v18, %v442_v28  ;;  %v5224_v21 = vld [vmem:[#allocation2 + $0x120] sm:$0xff]  ;;  %v5226_v25 = vld [vmem:[#allocation2 + $0x128] sm:$0xff]  ;;  %v1083_v27 = vrot.slane %v4996_v56, 2 }
  0x4c   : > { %6263 = vst [vmem:[#allocation23_spill] sm:$0xff] %v5206_v15  ;;  %v5222_v18 = vsel %vm1061_vm4, %v1072_v43, %v1073_v51  ;;  %v1087_v3 = vrot.slane %v5024_v0, 2  ;;  %v1088_v60 = vrot.slane %v5026_v1, 2  ;;  %s6127_s16 = scalar_lea.sflag [#allocation4], %s161_s4 }
  0x4d   : > { %3937 = vmatmul.mubr.msk.f32.gmra.mrb[10].mxu1 %vm201_vm1, %v5105_v34  ;;  %4134 = vmatmul.mubr.msk.f32.gmra.mrb[8].mxu0 %vm201_vm1, %v5105_v34  ;;  %v5238_v28 = vsel %vm393_vm3, %v445_v37, %v447_v14  ;;  %v5265_v14 = vld [vmem:[#allocation2 + $0x138] sm:$0xff] }
  0x4e   : > { %3939 = vmatprep.mubr.msk.f32.mxu1 %vm201_vm1, %v5109_v39  ;;  %4136 = vmatprep.mubr.msk.f32.mxu0 %vm201_vm1, %v5109_v39  ;;  %v5219_v39 = vld [vmem:[#allocation2 + $0x118] sm:$0x3]  ;;  %6265 = vst [vmem:[#allocation25_spill] sm:$0xff] %v5238_v28 }
  0x4f   : > { %v452_v34 = vrot.slane %v5219_v39, 1 }
  0x51   : > { %3940 = vmatmul.mubr.msk.f32.gmra.mrb[12].mxu1 %vm201_vm1, %v5128_v50  ;;  %4137 = vmatmul.mubr.msk.f32.gmra.mrb[10].mxu0 %vm201_vm1, %v5128_v50  ;;  %v1078_v50 = vrot.slane %v4980_v47, 2 }
  0x52   : > { %3942 = vmatprep.mubr.msk.f32.mxu1 %vm201_vm1, %v5132_v54  ;;  %4139 = vmatprep.mubr.msk.f32.mxu0 %vm201_vm1, %v5132_v54  ;;  %v450_v54 = vrot.slane %v5194_v61, 1 }
  0x54   : > { %v5282_v22 = vsel %vm393_vm3, %v450_v54, %v452_v34  ;;  %v5297_v34 = vld [vmem:[#allocation2 + $0x150] sm:$0xff] }
  0x55   : > { %3943 = vmatmul.mubr.msk.f32.gmra.mrb[14].mxu1 %vm201_vm1, %v5151_v10  ;;  %4140 = vmatmul.mubr.msk.f32.gmra.mrb[12].mxu0 %vm201_vm1, %v5151_v10  ;;  %v1075_v10 = vrot.slane %v4976_v45, 2  ;;  %v5231_v45 = vld [vmem:[%s6169_s1 + $0x1c] sm:$0x7]  ;;  %6270 = vst [vmem:[#allocation30_spill] sm:$0xff] %v5282_v22 }
  0x56   : > { %3945 = vmatprep.mubr.msk.f32.mxu1 %vm201_vm1, %v5158_v17  ;;  %4142 = vmatprep.mubr.msk.f32.mxu0 %vm201_vm1, %v5158_v17  ;;  %v5212_v17 = vsel %vm393_vm3, %v444_v29, %v445_v37  ;;  %v1080_v29 = vrot.slane %v4986_v52, 2  ;;  %v454_v37 = vrot.slane %v5224_v21, 1 }
  0x57   : > { %6264 = vst [vmem:[#allocation24_spill] sm:$0xff] %v5212_v17  ;;  %v5246_v43 = vsel %vm1061_vm4, %v1073_v51, %v1075_v10  ;;  %v455_v10 = vrot.slane %v5226_v25, 1  ;;  %v5261_v51 = vld [vmem:[#allocation2 + $0x130] sm:$0x3] }
  0x58   : > { %6266 = vst [vmem:[#allocation26_spill] sm:$0xff] %v5246_v43 }
  0x59   : > { %3946 = vmatmul.mubr.msk.f32.gmra.mrb[16].mxu1 %vm201_vm1, %v5177_v26  ;;  %4143 = vmatmul.mubr.msk.f32.gmra.mrb[14].mxu0 %vm201_vm1, %v5177_v26  ;;  %v449_v26 = vrot.slane %v5192_v59, 1 }
  0x5a   : > { %3948 = vmatprep.mubr.msk.f32.mxu1 %vm201_vm1, %v5185_v38  ;;  %4171 = vmatprep.mubr.msk.f32.mxu0 %vm201_vm1, %v5188_v40  ;;  %v1077_v38 = vrot.slane %v4978_v46, 2 }
  0x5b   : > { %v5254_v52 = vsel %vm393_vm3, %v449_v26, %v450_v54  ;;  %v5274_v26 = vsel %vm1061_vm4, %v1078_v50, %v1080_v29  ;;  %v459_v29 = vrot.slane %v5265_v14, 1  ;;  %v5299_v54 = vld [vmem:[#allocation2 + $0x158] sm:$0xff] }
  0x5c   : > { %6267 = vst [vmem:[#allocation27_spill] sm:$0xff] %v5254_v52  ;;  %6269 = vst [vmem:[#allocation29_spill] sm:$0xff] %v5274_v26 }
  0x5d   : > { %3949 = vmatmul.mubr.msk.f32.gmra.mrb[18].mxu1 %vm201_vm1, %v5206_v15  ;;  %4172 = vmatmul.mubr.msk.f32.vlgmr.msra.gmra.mrb[0].mxu0 %vm201_vm1, %v5209_v19  ;;  %v1082_v15 = vrot.slane %v4994_v55, 2 }
  0x5e   : > { %4220 = vmatpush3.msk.msra.mxu0 %vm540_vm0, %v5001_v57  ;;  %3951 = vmatprep.mubr.msk.f32.mxu1 %vm201_vm1, %v5212_v17  ;;  %v5257_v57 = vsel %vm1061_vm4, %v1077_v38, %v1078_v50  ;;  %v5267_v17 = vld [vmem:[#allocation2 + $0x140] sm:$0xff]  ;;  %v1085_v38 = vrot.slane %v5020_v63, 2  ;;  %v5289_v50 = vld [vmem:[#allocation2 + $0x148] sm:$0x3]  ;;  %v5292_v63 = vsel %vm393_vm3, %v454_v37, %v455_v10  ;;  %v1090_v37 = vrot.slane %v5040_v5, 2 }
  0x5f   : > { %4174 = vmatprep.mubr.msk.f32.mxu0 %vm201_vm1, %v5222_v18  ;;  %6268 = vst [vmem:[#allocation28_spill] sm:$0xff] %v5257_v57  ;;  %4269 = vmatprep.subr.msk.mxu0 %vm540_vm0, %v5231_v45  ;;  %v5285_v6 = vsel %vm1061_vm4, %v1082_v15, %v1083_v27  ;;  %6272 = vst [vmem:[#allocation32_spill] sm:$0xff] %v5292_v63  ;;  %v462_v15 = vrot.slane %v5289_v50, 1  ;;  %v5323_v5 = vsel %vm1061_vm4, %v1087_v3, %v1088_v60 }
  0x60   : > { %6271 = vst [vmem:[#allocation31_spill] sm:$0xff] %v5285_v6  ;;  %v5315_v53 = vsel %vm1061_vm4, %v1083_v27, %v1085_v38  ;;  %6276 = vst [vmem:[#allocation36_spill] sm:$0xff] %v5323_v5  ;;  %v5331_v27 = vld [vmem:[#allocation2 + $0x170] sm:$0xff]  ;;  %v5341_v3 = vsel %vm1061_vm4, %v1088_v60, %v1090_v37  ;;  %v1098_v37 = vrot.slane %v5093_v33, 2 }
  0x61   : > { %3952 = vmatmul.mubr.msk.f32.gmra.mrb[20].mxu1 %vm201_vm1, %v5238_v28  ;;  %4175 = vmatmul.mubr.msk.f32.gmra.mrb[2].mxu0 %vm201_vm1, %v5246_v43  ;;  %v457_v28 = vrot.slane %v5261_v51, 1  ;;  %6274 = vst [vmem:[#allocation34_spill] sm:$0xff] %v5315_v53  ;;  %v5327_v43 = vld [vmem:[#allocation2 + $0x160] sm:$0x3]  ;;  %6278 = vst [vmem:[#allocation38_spill] sm:$0xff] %v5341_v3  ;;  %v470_v60 = vrot.slane %v5331_v27, 1 }
  0x62   : > { %3954 = vmatprep.mubr.msk.f32.mxu1 %vm201_vm1, %v5254_v52  ;;  %4177 = vmatprep.mubr.msk.f32.mxu0 %vm201_vm1, %v5257_v57  ;;  %v460_v52 = vrot.slane %v5267_v17, 1 }
  0x63   : > { %v5312_v58 = vsel %vm393_vm3, %v455_v10, %v457_v28  ;;  %v5329_v28 = vld [vmem:[#allocation2 + $0x168] sm:$0xff] }
  0x64   : > { %6273 = vst [vmem:[#allocation33_spill] sm:$0xff] %v5312_v58  ;;  %v5320_v57 = vsel %vm393_vm3, %v459_v29, %v460_v52  ;;  %v5338_v10 = vsel %vm393_vm3, %v460_v52, %v462_v15  ;;  %v467_v29 = vrot.slane %v5327_v43, 1  ;;  %v1097_v15 = vrot.slane %v5091_v32, 2 }
  0x65   : > { %3955 = vmatmul.mubr.msk.f32.gmra.mrb[22].mxu1 %vm201_vm1, %v5282_v22  ;;  %4178 = vmatmul.mubr.msk.f32.gmra.mrb[4].mxu0 %vm201_vm1, %v5274_v26  ;;  %v464_v22 = vrot.slane %v5297_v34, 1  ;;  %v465_v26 = vrot.slane %v5299_v54, 1  ;;  %6275 = vst [vmem:[#allocation35_spill] sm:$0xff] %v5320_v57  ;;  %6277 = vst [vmem:[#allocation37_spill] sm:$0xff] %v5338_v10 }
  0x66   : > { %3957 = vmatprep.mubr.msk.f32.mxu1 %vm201_vm1, %v5292_v63  ;;  %4180 = vmatprep.mubr.msk.f32.mxu0 %vm201_vm1, %v5285_v6  ;;  %v1092_v63 = vrot.slane %v5047_v11, 2  ;;  %v1093_v6 = vrot.slane %v5049_v12, 2 }
  0x67   : > { %v5348_v38 = vsel %vm393_vm3, %v464_v22, %v465_v26  ;;  %v5370_v22 = vsel %vm393_vm3, %v465_v26, %v467_v29  ;;  %v1107_v26 = vrot.slane %v5138_v4, 2  ;;  %v1108_v29 = vrot.slane %v5140_v7, 2 }
  0x68   : > { %6279 = vst [vmem:[#allocation39_spill] sm:$0xff] %v5348_v38  ;;  %v5354_v52 = vsel %vm1061_vm4, %v1092_v63, %v1093_v6  ;;  %6281 = vst [vmem:[#allocation41_spill] sm:$0xff] %v5370_v22 }
  0x69   : > { %3958 = vmatmul.mubr.msk.f32.gmra.mrb[24].mxu1 %vm201_vm1, %v5312_v58  ;;  %4181 = vmatmul.mubr.msk.f32.gmra.mrb[6].mxu0 %vm201_vm1, %v5315_v53  ;;  %v1095_v58 = vrot.slane %v5085_v30, 2  ;;  %v469_v53 = vrot.slane %v5329_v28, 1  ;;  %6280 = vst [vmem:[#allocation40_spill] sm:$0xff] %v5354_v52 }
  0x6a   : > { %3960 = vmatprep.mubr.msk.f32.mxu1 %vm201_vm1, %v5320_v57  ;;  %4183 = vmatprep.mubr.msk.f32.mxu0 %vm201_vm1, %v5323_v5  ;;  %v5359_v57 = vld [vmem:[#allocation2 + $0x178] sm:$0x3]  ;;  %v1100_v5 = vrot.slane %v5113_v44, 2 }
  0x6b   : > { %v5373_v30 = vsel %vm1061_vm4, %v1093_v6, %v1095_v58  ;;  %v472_v63 = vrot.slane %v5359_v57, 1  ;;  %v1105_v6 = vrot.slane %v5136_v62, 2 }
  0x6c   : > { %v5397_v58 = vsel %vm1061_vm4, %v1098_v37, %v1100_v5  ;;  %v1110_v5 = vrot.slane %v5163_v23, 2 }
  0x6d   : > { %3961 = vmatmul.mubr.msk.f32.gmra.mrb[26].mxu1 %vm201_vm1, %v5338_v10  ;;  %4184 = vmatmul.mubr.msk.f32.gmra.mrb[8].mxu0 %vm201_vm1, %v5341_v3  ;;  %v5378_v10 = vsel %vm393_vm3, %v469_v53, %v470_v60  ;;  %v5381_v3 = vsel %vm1061_vm4, %v1097_v15, %v1098_v37  ;;  %v5394_v53 = vsel %vm393_vm3, %v470_v60, %v472_v63  ;;  %v1112_v60 = vrot.slane %v5155_v16, 2 }
  0x6e   : > { %3963 = vmatprep.mubr.msk.f32.mxu1 %vm201_vm1, %v5348_v38  ;;  %4186 = vmatprep.mubr.msk.f32.mxu0 %vm201_vm1, %v5354_v52  ;;  %6282 = vst [vmem:[#allocation42_spill] sm:$0xff] %v5378_v10  ;;  %v1102_v38 = vrot.slane %v5115_v48, 2  ;;  %v1103_v52 = vrot.slane %v5117_v49, 2  ;;  %6283 = vst [vmem:[#allocation43_spill] sm:$0xff] %v5394_v53  ;;  %v1113_v15 = vrot.slane %v5165_v24, 2  ;;  %v5436_v23 = vsel %vm1061_vm4, %v1108_v29, %v1110_v5 }
  0x6f   : > { %v1115_v37 = vrot.slane %v5182_v31, 2  ;;  %v1120_v31 = vrot.slane %v5219_v39, 2  ;;  %v1122_v5 = vrot.slane %v5224_v21, 2 }
  0x70   : > { %v5401_v44 = vsel %vm1061_vm4, %v1102_v38, %v1103_v52  ;;  %v5414_v62 = vsel %vm1061_vm4, %v1103_v52, %v1105_v6  ;;  %v5418_v38 = vsel %vm1061_vm4, %v1107_v26, %v1108_v29  ;;  %v5429_v52 = vld [vmem:[%s6169_s1 + $0xc] sm:$0x7]  ;;  %v5442_v63 = vsel %vm1061_vm4, %v1112_v60, %v1113_v15 }
  0x71   : > { %3964 = vmatmul.mubr.msk.f32.gmra.mrb[28].mxu1 %vm201_vm1, %v5370_v22  ;;  %4187 = vmatmul.mubr.msk.f32.gmra.mrb[10].mxu0 %vm201_vm1, %v5373_v30  ;;  %v1117_v6 = vrot.slane %v5192_v59, 2  ;;  %v1118_v26 = vrot.slane %v5194_v61, 2  ;;  %v1123_v60 = vrot.slane %v5226_v25, 2  ;;  %v1138_v22 = vrot.slane %v5331_v27, 2 }
  0x72   : > { %3966 = vmatprep.mubr.msk.f32.mxu1 %vm201_vm1, %v5378_v10  ;;  %4189 = vmatprep.mubr.msk.f32.mxu0 %vm201_vm1, %v5381_v3  ;;  %v1133_v10 = vrot.slane %v5299_v54, 2 }
  0x73   : > { %v5461_v29 = vsel %vm1061_vm4, %v1117_v6, %v1118_v26  ;;  %v5474_v39 = vsel %vm1061_vm4, %v1118_v26, %v1120_v31  ;;  %v1127_v6 = vrot.slane %v5265_v14, 2  ;;  %v1130_v26 = vrot.slane %v5289_v50, 2 }
  0x74   : > { %6284 = vst [vmem:[#allocation44_spill] sm:$0xff] %v5461_v29 }
  0x75   : > { %3967 = vmatmul.mubr.msk.f32.gmra.mrb[30].mxu1 %vm201_vm1, %v5394_v53  ;;  %4190 = vmatmul.mubr.msk.f32.gmra.mrb[12].mxu0 %vm201_vm1, %v5397_v58  ;;  %v1128_v53 = vrot.slane %v5267_v17, 2 }
  0x76   : > { %3971 = vmatprep.mubr.msk.f32.mxu1 %vm201_vm1, %v4900_v8  ;;  %4192 = vmatprep.mubr.msk.f32.mxu0 %vm201_vm1, %v5401_v44 }
  0x77   : > { %v5495_v31 = vsel %vm1061_vm4, %v1127_v6, %v1128_v53  ;;  %v5508_v50 = vsel %vm1061_vm4, %v1128_v53, %v1130_v26  ;;  %v1137_v6 = vrot.slane %v5329_v28, 2  ;;  %v1140_v53 = vrot.slane %v5359_v57, 2 }
  0x78   : > { %6286 = vst [vmem:[#allocation46_spill] sm:$0xff] %v5495_v31  ;;  %6287 = vst [vmem:[#allocation47_spill] sm:$0xff] %v5508_v50 }
  0x79   : > { %3972 = vmatmul.mubr.msk.f32.vlgmr.msra.gmra.mrb[0].mxu1 %vm201_vm1, %v4902_v9  ;;  %4193 = vmatmul.mubr.msk.f32.gmra.mrb[14].mxu0 %vm201_vm1, %v5414_v62  ;;  %v5533_v26 = vsel %vm1061_vm4, %v1137_v6, %v1138_v22  ;;  %v5548_v57 = vsel %vm1061_vm4, %v1138_v22, %v1140_v53  ;;  %v5576_v6 = vld [vmem:[%s6169_s1 + $0x20] sm:$0x7]  ;;  %v1065_v53 = vrot.slane %v4910_v13, 2 }
  0x7a   : > { %3974 = vmatprep.mubr.msk.f32.mxu1 %vm201_vm1, %v4956_v35  ;;  %4195 = vmatprep.mubr.msk.f32.mxu0 %vm201_vm1, %v5418_v38  ;;  %v5518_v35 = vld [vmem:[#allocation2 + $0x188] sm:$0xff]  ;;  %6290 = vst [vmem:[#allocation50_spill] sm:$0xff] %v5533_v26  ;;  %6291 = vst [vmem:[#allocation51_spill] sm:$0xff] %v5548_v57  ;;  %v6295_v13 = vld [vmem:[#allocation28_spill] sm:$0xff] }
  0x7b   : > { %4020 = vmatpush3.msk.msra.mxu1 %vm540_vm0, %v4924_v20  ;;  %v5457_v20 = vsel %vm1061_vm4, %v1113_v15, %v1115_v37  ;;  %v1125_v15 = vrot.slane %v5261_v51, 2  ;;  %v5478_v37 = vsel %vm1061_vm4, %v1122_v5, %v1123_v60  ;;  %v1132_v5 = vrot.slane %v5297_v34, 2 }
  0x7c   : > { %4069 = vmatprep.subr.msk.mxu1 %vm540_vm0, %v5429_v52 }
  0x7d   : > { %3975 = vmatmul.mubr.msk.f32.gmra.mrb[2].mxu1 %vm201_vm1, %v4958_v36  ;;  %4196 = vmatmul.mubr.msk.f32.gmra.mrb[16].mxu0 %vm201_vm1, %v5436_v23  ;;  %v5491_v51 = vsel %vm1061_vm4, %v1123_v60, %v1125_v15  ;;  %v1135_v60 = vrot.slane %v5327_v43, 2  ;;  %v5512_v15 = vsel %vm1061_vm4, %v1132_v5, %v1133_v10  ;;  %v5516_v36 = vld [vmem:[#allocation2 + $0x180] sm:$0xff] }
  0x7e   : > { %3977 = vmatprep.mubr.msk.f32.mxu1 %vm201_vm1, %v4970_v41  ;;  %4198 = vmatprep.mubr.msk.f32.mxu0 %vm201_vm1, %v5442_v63  ;;  %6285 = vst [vmem:[#allocation45_spill] sm:$0xff] %v5491_v51  ;;  %6288 = vst [vmem:[#allocation48_spill] sm:$0xff] %v5512_v15  ;;  %v2008_v5 = vrot.slane %v5516_v36, 2 }
  0x7f   : > { %v5529_v43 = vsel %vm1061_vm4, %v1133_v10, %v1135_v60 }
  0x80   : > { %6289 = vst [vmem:[#allocation49_spill] sm:$0xff] %v5529_v43 }
  0x81   : > { %3978 = vmatmul.mubr.msk.f32.gmra.mrb[4].mxu1 %vm201_vm1, %v4972_v42  ;;  %4199 = vmatmul.mubr.msk.f32.gmra.mrb[18].mxu0 %vm201_vm1, %v5457_v20 }
  0x82   : > { %3980 = vmatprep.mubr.msk.f32.mxu1 %vm201_vm1, %v4978_v46  ;;  %4201 = vmatprep.mubr.msk.f32.mxu0 %vm201_vm1, %v5461_v29 }
  0x85   : > { %3981 = vmatmul.mubr.msk.f32.gmra.mrb[6].mxu1 %vm201_vm1, %v4980_v47  ;;  %4202 = vmatmul.mubr.msk.f32.gmra.mrb[20].mxu0 %vm201_vm1, %v5474_v39 }
  0x86   : > { %3983 = vmatprep.mubr.msk.f32.mxu1 %vm201_vm1, %v4994_v55  ;;  %4204 = vmatprep.mubr.msk.f32.mxu0 %vm201_vm1, %v5478_v37 }
  0x89   : > { %3984 = vmatmul.mubr.msk.f32.gmra.mrb[8].mxu1 %vm201_vm1, %v4996_v56  ;;  %4205 = vmatmul.mubr.msk.f32.gmra.mrb[22].mxu0 %vm201_vm1, %v5491_v51  ;;  %v5537_v51 = vld [vmem:[#allocation2 + $0x190] sm:$0x3] }
  0x8a   : > { %3986 = vmatprep.mubr.msk.f32.mxu1 %vm201_vm1, %v5024_v0  ;;  %4207 = vmatprep.mubr.msk.f32.mxu0 %vm201_vm1, %v5495_v31  ;;  %v2009_v31 = vrot.slane %v5518_v35, 2  ;;  %v2011_v10 = vrot.slane %v5537_v51, 2 }
  0x8c   : > { %v5552_v60 = vsel %vm1061_vm4, %v2008_v5, %v2009_v31  ;;  %v5563_v22 = vsel %vm1061_vm4, %v2009_v31, %v2011_v10  ;;  %v1063_v31 = vrot.slane %v4902_v9, 2  ;;  %v6294_v9 = vld [vmem:[#allocation26_spill] sm:$0xff] }
  0x8d   : > { %3987 = vmatmul.mubr.msk.f32.gmra.mrb[10].mxu1 %vm201_vm1, %v5026_v1  ;;  %4208 = vmatmul.mubr.msk.f32.gmra.mrb[24].mxu0 %vm201_vm1, %v5508_v50  ;;  %6292 = vst [vmem:[#allocation52_spill] sm:$0xff] %v5552_v60  ;;  %6293 = vst [vmem:[#allocation53_spill] sm:$0xff] %v5563_v22  ;;  %v6300_v10 = vld [vmem:[#allocation38_spill] sm:$0xff] }
  0x8e   : > { %3989 = vmatprep.mubr.msk.f32.mxu1 %vm201_vm1, %v5047_v11  ;;  %4210 = vmatprep.mubr.msk.f32.mxu0 %vm201_vm1, %v5512_v15 }
  0x91   : > { %3990 = vmatmul.mubr.msk.f32.gmra.mrb[12].mxu1 %vm201_vm1, %v5049_v12  ;;  %4211 = vmatmul.mubr.msk.f32.gmra.mrb[26].mxu0 %vm201_vm1, %v5529_v43 }
  0x92   : > { %3992 = vmatprep.mubr.msk.f32.mxu1 %vm201_vm1, %v5091_v32  ;;  %4213 = vmatprep.mubr.msk.f32.mxu0 %vm201_vm1, %v5533_v26 }
  0x95   : > { %3993 = vmatmul.mubr.msk.f32.gmra.mrb[14].mxu1 %vm201_vm1, %v5093_v33  ;;  %4214 = vmatmul.mubr.msk.f32.gmra.mrb[28].mxu0 %vm201_vm1, %v5548_v57 }
  0x96   : > { %3995 = vmatprep.mubr.msk.f32.mxu1 %vm201_vm1, %v5115_v48  ;;  %4216 = vmatprep.mubr.msk.f32.mxu0 %vm201_vm1, %v5552_v60  ;;  %v6305_v60 = vld [vmem:[#allocation11_spill] sm:$0xff] }
  0x99   : > { %3996 = vmatmul.mubr.msk.f32.gmra.mrb[16].mxu1 %vm201_vm1, %v5117_v49  ;;  %4217 = vmatmul.mubr.msk.f32.gmra.mrb[30].mxu0 %vm201_vm1, %v5563_v22  ;;  %v6304_v22 = vld [vmem:[#allocation10_spill] sm:$0xff] }
  0x9a   : > { %3998 = vmatprep.mubr.msk.f32.mxu1 %vm201_vm1, %v5138_v4  ;;  %4221 = vmatprep.mubr.msk.f32.mxu0 %vm201_vm1, %v4970_v41 }
  0x9d   : > { %3999 = vmatmul.mubr.msk.f32.gmra.mrb[18].mxu1 %vm201_vm1, %v5140_v7  ;;  %4222 = vmatmul.mubr.msk.f32.vlgmr.msra.gmra.mrb[0].mxu0 %vm201_vm1, %v4972_v42 }
  0x9e   : > { %4270 = vmatpush3.msk.msra.mxu0 %vm540_vm0, %v5231_v45  ;;  %4001 = vmatprep.mubr.msk.f32.mxu1 %vm201_vm1, %v5155_v16  ;;  %v1062_v45 = vrot.slane %v4900_v8, 2  ;;  %v1066_v8 = vsel %vm1061_vm4, %v1063_v31, %v1065_v53  ;;  %v5711_v53 = vld [vmem:[#allocation2 + $0x1a0] sm:$0xff] }
  0x9f   : > { %4224 = vmatprep.mubr.msk.f32.mxu0 %vm201_vm1, %v4978_v46  ;;  %4319 = vmatprep.subr.msk.mxu0 %vm540_vm0, %v5576_v6 }
  0xa0   : > { %v1064_v5 = vsel %vm1061_vm4, %v1062_v45, %v1063_v31  ;;  %v6301_v45 = vld [vmem:[#allocation40_spill] sm:$0xff]  ;;  %v5701_v31 = vld [vmem:[#allocation2 + $0x198] sm:$0xff] }
  0xa1   : > { %4002 = vmatmul.mubr.msk.f32.gmra.mrb[20].mxu1 %vm201_vm1, %v5165_v24  ;;  %4225 = vmatmul.mubr.msk.f32.gmra.mrb[2].mxu0 %vm201_vm1, %v4980_v47 }
  0xa2   : > { %4004 = vmatprep.mubr.msk.f32.mxu1 %vm201_vm1, %v5192_v59  ;;  %4227 = vmatprep.mubr.msk.f32.mxu0 %vm201_vm1, %v4994_v55 }
  0xa5   : > { %4005 = vmatmul.mubr.msk.f32.gmra.mrb[22].mxu1 %vm201_vm1, %v5194_v61  ;;  %4228 = vmatmul.mubr.msk.f32.gmra.mrb[4].mxu0 %vm201_vm1, %v4996_v56 }
  0xa6   : > { %4007 = vmatprep.mubr.msk.f32.mxu1 %vm201_vm1, %v5224_v21  ;;  %4230 = vmatprep.mubr.msk.f32.mxu0 %vm201_vm1, %v5024_v0 }
  0xa9   : > { %4008 = vmatmul.mubr.msk.f32.gmra.mrb[24].mxu1 %vm201_vm1, %v5226_v25  ;;  %4231 = vmatmul.mubr.msk.f32.gmra.mrb[6].mxu0 %vm201_vm1, %v5026_v1 }
  0xaa   : > { %4010 = vmatprep.mubr.msk.f32.mxu1 %vm201_vm1, %v5265_v14  ;;  %4233 = vmatprep.mubr.msk.f32.mxu0 %vm201_vm1, %v5047_v11 }
  0xad   : > { %4011 = vmatmul.mubr.msk.f32.gmra.mrb[26].mxu1 %vm201_vm1, %v5267_v17  ;;  %4234 = vmatmul.mubr.msk.f32.gmra.mrb[8].mxu0 %vm201_vm1, %v5049_v12 }
  0xae   : > { %4013 = vmatprep.mubr.msk.f32.mxu1 %vm201_vm1, %v5297_v34  ;;  %4236 = vmatprep.mubr.msk.f32.mxu0 %vm201_vm1, %v5091_v32 }
  0xb1   : > { %4014 = vmatmul.mubr.msk.f32.gmra.mrb[28].mxu1 %vm201_vm1, %v5299_v54  ;;  %4237 = vmatmul.mubr.msk.f32.gmra.mrb[10].mxu0 %vm201_vm1, %v5093_v33 }
  0xb2   : > { %4016 = vmatprep.mubr.msk.f32.mxu1 %vm201_vm1, %v5329_v28  ;;  %4239 = vmatprep.mubr.msk.f32.mxu0 %vm201_vm1, %v5115_v48 }
  0xb5   : > { %4017 = vmatmul.mubr.msk.f32.gmra.mrb[30].mxu1 %vm201_vm1, %v5331_v27  ;;  %4240 = vmatmul.mubr.msk.f32.gmra.mrb[12].mxu0 %vm201_vm1, %v5117_v49 }
  0xb6   : > { %4021 = vmatprep.mubr.msk.f32.mxu1 %vm201_vm1, %v1064_v5  ;;  %4242 = vmatprep.mubr.msk.f32.mxu0 %vm201_vm1, %v5138_v4  ;;  %v6302_v5 = vld [vmem:[#allocation8_spill] sm:$0xff] }
  0xb9   : > { %4022 = vmatmul.mubr.msk.f32.vlgmr.msra.gmra.mrb[0].mxu1 %vm201_vm1, %v1066_v8  ;;  %4243 = vmatmul.mubr.msk.f32.gmra.mrb[14].mxu0 %vm201_vm1, %v5140_v7  ;;  %v6303_v8 = vld [vmem:[#allocation9_spill] sm:$0xff] }
  0xba   : > { %4024 = vmatprep.mubr.msk.f32.mxu1 %vm201_vm1, %v5188_v40  ;;  %4245 = vmatprep.mubr.msk.f32.mxu0 %vm201_vm1, %v5155_v16  ;;  %v6297_v40 = vld [vmem:[#allocation31_spill] sm:$0xff] }
  0xbb   : > { %4070 = vmatpush3.msk.msra.mxu1 %vm540_vm0, %v5429_v52  ;;  %v6299_v52 = vld [vmem:[#allocation36_spill] sm:$0xff] }
  0xbc   : > { %4369 = vmatprep.subr.msk.mxu1 %vm540_vm0, %v4849_v2  ;;  %v6296_v2 = vld [vmem:[#allocation29_spill] sm:$0xff] }
  0xbd   : > { %4025 = vmatmul.mubr.msk.f32.gmra.mrb[2].mxu1 %vm201_vm1, %v5209_v19  ;;  %4246 = vmatmul.mubr.msk.f32.gmra.mrb[16].mxu0 %vm201_vm1, %v5165_v24  ;;  %v6298_v19 = vld [vmem:[#allocation34_spill] sm:$0xff] }
  0xbe   : > { %4027 = vmatprep.mubr.msk.f32.mxu1 %vm201_vm1, %v5222_v18  ;;  %4248 = vmatprep.mubr.msk.f32.mxu0 %vm201_vm1, %v5192_v59 }
  0xc1   : > { %4028 = vmatmul.mubr.msk.f32.gmra.mrb[4].mxu1 %vm201_vm1, %v6294_v9  ;;  %4249 = vmatmul.mubr.msk.f32.gmra.mrb[18].mxu0 %vm201_vm1, %v5194_v61 }
  0xc2   : > { %4030 = vmatprep.mubr.msk.f32.mxu1 %vm201_vm1, %v6295_v13  ;;  %4251 = vmatprep.mubr.msk.f32.mxu0 %vm201_vm1, %v5224_v21 }
  0xc5   : > { %4031 = vmatmul.mubr.msk.f32.gmra.mrb[6].mxu1 %vm201_vm1, %v6296_v2  ;;  %4252 = vmatmul.mubr.msk.f32.gmra.mrb[20].mxu0 %vm201_vm1, %v5226_v25 }
  0xc6   : > { %4033 = vmatprep.mubr.msk.f32.mxu1 %vm201_vm1, %v6297_v40  ;;  %4254 = vmatprep.mubr.msk.f32.mxu0 %vm201_vm1, %v5265_v14 }
  0xc9   : > { %4034 = vmatmul.mubr.msk.f32.gmra.mrb[8].mxu1 %vm201_vm1, %v6298_v19  ;;  %4255 = vmatmul.mubr.msk.f32.gmra.mrb[22].mxu0 %vm201_vm1, %v5267_v17 }
  0xca   : > { %4036 = vmatprep.mubr.msk.f32.mxu1 %vm201_vm1, %v6299_v52  ;;  %4257 = vmatprep.mubr.msk.f32.mxu0 %vm201_vm1, %v5297_v34 }
  0xcd   : > { %4037 = vmatmul.mubr.msk.f32.gmra.mrb[10].mxu1 %vm201_vm1, %v6300_v10  ;;  %4258 = vmatmul.mubr.msk.f32.gmra.mrb[24].mxu0 %vm201_vm1, %v5299_v54 }
  0xce   : > { %4039 = vmatprep.mubr.msk.f32.mxu1 %vm201_vm1, %v6301_v45  ;;  %4260 = vmatprep.mubr.msk.f32.mxu0 %vm201_vm1, %v5329_v28 }
  0xd1   : > { %4040 = vmatmul.mubr.msk.f32.gmra.mrb[12].mxu1 %vm201_vm1, %v5373_v30  ;;  %4261 = vmatmul.mubr.msk.f32.gmra.mrb[26].mxu0 %vm201_vm1, %v5331_v27 }
  0xd2   : > { %4042 = vmatprep.mubr.msk.f32.mxu1 %vm201_vm1, %v5381_v3  ;;  %4263 = vmatprep.mubr.msk.f32.mxu0 %vm201_vm1, %v5516_v36 }
  0xd5   : > { %4043 = vmatmul.mubr.msk.f32.gmra.mrb[14].mxu1 %vm201_vm1, %v5397_v58  ;;  %4264 = vmatmul.mubr.msk.f32.gmra.mrb[28].mxu0 %vm201_vm1, %v5518_v35 }
  0xd6   : > { %4045 = vmatprep.mubr.msk.f32.mxu1 %vm201_vm1, %v5401_v44  ;;  %4266 = vmatprep.mubr.msk.f32.mxu0 %vm201_vm1, %v5701_v31 }
  0xd9   : > { %4046 = vmatmul.mubr.msk.f32.gmra.mrb[16].mxu1 %vm201_vm1, %v5414_v62  ;;  %4267 = vmatmul.mubr.msk.f32.gmra.mrb[30].mxu0 %vm201_vm1, %v5711_v53 }
  0xda   : > { %4048 = vmatprep.mubr.msk.f32.mxu1 %vm201_vm1, %v5418_v38  ;;  %4271 = vmatprep.mubr.msk.f32.mxu0 %vm201_vm1, %v6302_v5  ;;  %v6306_v5 = vld [vmem:[#allocation12_spill] sm:$0xff] }
  0xdd   : > { %4049 = vmatmul.mubr.msk.f32.gmra.mrb[18].mxu1 %vm201_vm1, %v5436_v23  ;;  %4272 = vmatmul.mubr.msk.f32.vlgmr.msra.gmra.mrb[0].mxu0 %vm201_vm1, %v6303_v8  ;;  %v6309_v8 = vld [vmem:[#allocation45_spill] sm:$0xff] }
  0xde   : > { %4320 = vmatpush3.msk.msra.mxu0 %vm540_vm0, %v5576_v6  ;;  %4051 = vmatprep.mubr.msk.f32.mxu1 %vm201_vm1, %v5442_v63  ;;  %v6307_v6 = vld [vmem:[#allocation13_spill] sm:$0xff] }
  0xdf   : > { %4274 = vmatprep.mubr.msk.f32.mxu0 %vm201_vm1, %v6304_v22  ;;  %v6308_v22 = vld [vmem:[#allocation14_spill] sm:$0xff] }
  0xe1   : > { %4052 = vmatmul.mubr.msk.f32.gmra.mrb[20].mxu1 %vm201_vm1, %v5457_v20  ;;  %4275 = vmatmul.mubr.msk.f32.gmra.mrb[2].mxu0 %vm201_vm1, %v6305_v60  ;;  %v6310_v60 = vld [vmem:[#allocation15_spill] sm:$0xff] }
  0xe2   : > { %4054 = vmatprep.mubr.msk.f32.mxu1 %vm201_vm1, %v5461_v29  ;;  %4277 = vmatprep.mubr.msk.f32.mxu0 %vm201_vm1, %v6306_v5  ;;  %v6311_v29 = vld [vmem:[#allocation46_spill] sm:$0xff]  ;;  %v6312_v5 = vld [vmem:[#allocation16_spill] sm:$0xff] }
  0xe5   : > { %4055 = vmatmul.mubr.msk.f32.gmra.mrb[22].mxu1 %vm201_vm1, %v5474_v39  ;;  %4278 = vmatmul.mubr.msk.f32.gmra.mrb[4].mxu0 %vm201_vm1, %v6307_v6  ;;  %v6313_v6 = vld [vmem:[#allocation17_spill] sm:$0xff] }
  0xe6   : > { %4057 = vmatprep.mubr.msk.f32.mxu1 %vm201_vm1, %v5478_v37  ;;  %4280 = vmatprep.mubr.msk.f32.mxu0 %vm201_vm1, %v6308_v22  ;;  %v6314_v22 = vld [vmem:[#allocation18_spill] sm:$0xff] }
  0xe9   : > { %4058 = vmatmul.mubr.msk.f32.gmra.mrb[24].mxu1 %vm201_vm1, %v6309_v8  ;;  %4281 = vmatmul.mubr.msk.f32.gmra.mrb[6].mxu0 %vm201_vm1, %v6310_v60  ;;  %v6315_v60 = vld [vmem:[#allocation19_spill] sm:$0xff] }
  0xea   : > { %4060 = vmatprep.mubr.msk.f32.mxu1 %vm201_vm1, %v6311_v29  ;;  %4283 = vmatprep.mubr.msk.f32.mxu0 %vm201_vm1, %v6312_v5  ;;  %v6316_v5 = vld [vmem:[#allocation20_spill] sm:$0xff] }
  0xed   : > { %4061 = vmatmul.mubr.msk.f32.gmra.mrb[26].mxu1 %vm201_vm1, %v5508_v50  ;;  %4284 = vmatmul.mubr.msk.f32.gmra.mrb[8].mxu0 %vm201_vm1, %v6313_v6  ;;  %v6317_v6 = vld [vmem:[#allocation21_spill] sm:$0xff] }
  0xee   : > { %4063 = vmatprep.mubr.msk.f32.mxu1 %vm201_vm1, %v5512_v15  ;;  %4286 = vmatprep.mubr.msk.f32.mxu0 %vm201_vm1, %v6314_v22  ;;  %v6318_v15 = vld [vmem:[#allocation6_spill] sm:$0xff] }
  0xef   : > { %v6319_v22 = vld [vmem:[#allocation22_spill] sm:$0xff] }
  0xf1   : > { %4064 = vmatmul.mubr.msk.f32.gmra.mrb[28].mxu1 %vm201_vm1, %v5529_v43  ;;  %4287 = vmatmul.mubr.msk.f32.gmra.mrb[10].mxu0 %vm201_vm1, %v6315_v60  ;;  %v6320_v43 = vld [vmem:[#allocation7_spill] sm:$0xff] }
  0xf2   : > { %4066 = vmatprep.mubr.msk.f32.mxu1 %vm201_vm1, %v5533_v26  ;;  %4289 = vmatprep.mubr.msk.f32.mxu0 %vm201_vm1, %v6316_v5  ;;  %v6321_v60 = vld [vmem:[#allocation23_spill] sm:$0xff]  ;;  %v6322_v5 = vld [vmem:[#allocation24_spill] sm:$0xff]  ;;  %v2548_v26 = vrot.slane %v5701_v31, 1 }
  0xf5   : > { %4067 = vmatmul.mubr.msk.f32.gmra.mrb[30].mxu1 %vm201_vm1, %v5548_v57  ;;  %4290 = vmatmul.mubr.msk.f32.gmra.mrb[12].mxu0 %vm201_vm1, %v6317_v6  ;;  %v4669_v6 = vld [vmem:[%s6169_s1 + $0x10] sm:$0x7]  ;;  %v1738_v57 = vrot.slane %v5518_v35, 1 }
  0xf6   : > { %4071 = vmatprep.mubr.msk.f32.mxu1 %vm201_vm1, %v6318_v15  ;;  %4292 = vmatprep.mubr.msk.f32.mxu0 %vm201_vm1, %v6319_v22  ;;  %v6323_v15 = vld [vmem:[#allocation25_spill] sm:$0xff] }
  0xf9   : > { %4072 = vmatmul.mubr.msk.f32.vlgmr.msra.gmra.mrb[0].mxu1 %vm201_vm1, %v6320_v43  ;;  %4293 = vmatmul.mubr.msk.f32.gmra.mrb[14].mxu0 %vm201_vm1, %v6321_v60  ;;  %v6324_v43 = vld [vmem:[#allocation27_spill] sm:$0xff] }
  0xfa   : > { %4074 = vmatprep.mubr.msk.f32.mxu1 %vm201_vm1, %v4970_v41  ;;  %4295 = vmatprep.mubr.msk.f32.mxu0 %vm201_vm1, %v6322_v5  ;;  %v6325_v41 = vld [vmem:[#allocation30_spill] sm:$0xff] }
  0xfb   : > { %4370 = vmatpush3.msk.msra.mxu1 %vm540_vm0, %v4669_v6  ;;  %v6326_v6 = vld [vmem:[#allocation32_spill] sm:$0xff] }
  0xfd   : > { %4075 = vmatmul.mubr.msk.f32.gmra.mrb[2].mxu1 %vm201_vm1, %v4972_v42  ;;  %4296 = vmatmul.mubr.msk.f32.gmra.mrb[16].mxu0 %vm201_vm1, %v6323_v15  ;;  %v6327_v42 = vld [vmem:[#allocation33_spill] sm:$0xff] }
  0xfe   : > { %4077 = vmatprep.mubr.msk.f32.mxu1 %vm201_vm1, %v4978_v46  ;;  %4298 = vmatprep.mubr.msk.f32.mxu0 %vm201_vm1, %v6324_v43  ;;  %v6328_v46 = vld [vmem:[#allocation35_spill] sm:$0xff] }
 0x101   : > { %4078 = vmatmul.mubr.msk.f32.gmra.mrb[4].mxu1 %vm201_vm1, %v4980_v47  ;;  %4299 = vmatmul.mubr.msk.f32.gmra.mrb[18].mxu0 %vm201_vm1, %v6325_v41  ;;  %v6329_v47 = vld [vmem:[#allocation37_spill] sm:$0xff] }
 0x102   : > { %4080 = vmatprep.mubr.msk.f32.mxu1 %vm201_vm1, %v4994_v55  ;;  %4301 = vmatprep.mubr.msk.f32.mxu0 %vm201_vm1, %v6326_v6  ;;  %v6330_v55 = vld [vmem:[#allocation39_spill] sm:$0xff] }
 0x105   : > { %4081 = vmatmul.mubr.msk.f32.gmra.mrb[6].mxu1 %vm201_vm1, %v4996_v56  ;;  %4302 = vmatmul.mubr.msk.f32.gmra.mrb[20].mxu0 %vm201_vm1, %v6327_v42  ;;  %v1737_v56 = vrot.slane %v5516_v36, 1 }
 0x106   : > { %4083 = vmatprep.mubr.msk.f32.mxu1 %vm201_vm1, %v5024_v0  ;;  %4304 = vmatprep.mubr.msk.f32.mxu0 %vm201_vm1, %v6328_v46  ;;  %v6331_v0 = vld [vmem:[#allocation41_spill] sm:$0xff] }
 0x107   : > { %v5837_v50 = vsel %vm393_vm3, %v1737_v56, %v1738_v57 }
 0x109   : > { %4084 = vmatmul.mubr.msk.f32.gmra.mrb[8].mxu1 %vm201_vm1, %v5026_v1  ;;  %4305 = vmatmul.mubr.msk.f32.gmra.mrb[22].mxu0 %vm201_vm1, %v6329_v47  ;;  %v6332_v1 = vld [vmem:[#allocation42_spill] sm:$0xff]  ;;  %v5839_v47 = vld [vmem:[#allocation2 + $0x1a8] sm:$0x3] }
 0x10a   : > { %4086 = vmatprep.mubr.msk.f32.mxu1 %vm201_vm1, %v5047_v11  ;;  %4307 = vmatprep.mubr.msk.f32.mxu0 %vm201_vm1, %v6330_v55  ;;  %v1740_v11 = vrot.slane %v5537_v51, 1  ;;  %v2549_v55 = vrot.slane %v5711_v53, 1  ;;  %v2551_v51 = vrot.slane %v5839_v47, 1 }
 0x10c   : > { %v2550_v56 = vsel %vm393_vm3, %v2548_v26, %v2549_v55  ;;  %v6008_v26 = vld [vmem:[%s6170_s2] ss:$0 sm:$0xff] }
 0x10d   : > { %4087 = vmatmul.mubr.msk.f32.gmra.mrb[10].mxu1 %vm201_vm1, %v5049_v12  ;;  %4308 = vmatmul.mubr.msk.f32.gmra.mrb[24].mxu0 %vm201_vm1, %v6331_v0  ;;  %v6333_v12 = vld [vmem:[#allocation43_spill] sm:$0xff] }
 0x10e   : > { %4089 = vmatprep.mubr.msk.f32.mxu1 %vm201_vm1, %v5091_v32  ;;  %4310 = vmatprep.mubr.msk.f32.mxu0 %vm201_vm1, %v6332_v1  ;;  %v5850_v32 = vsel %vm393_vm3, %v1738_v57, %v1740_v11 }
 0x111   : > { %4090 = vmatmul.mubr.msk.f32.gmra.mrb[12].mxu1 %vm201_vm1, %v5093_v33  ;;  %4311 = vmatmul.mubr.msk.f32.gmra.mrb[26].mxu0 %vm201_vm1, %v6333_v12  ;;  %v2552_v33 = vsel %vm393_vm3, %v2549_v55, %v2551_v51 }
 0x112   : > { %4092 = vmatprep.mubr.msk.f32.mxu1 %vm201_vm1, %v5115_v48  ;;  %4313 = vmatprep.mubr.msk.f32.mxu0 %vm201_vm1, %v5837_v50  ;;  %v6336_v48 = vld [vmem:[#allocation47_spill] sm:$0xff] }
 0x115   : > { %4093 = vmatmul.mubr.msk.f32.gmra.mrb[14].mxu1 %vm201_vm1, %v5117_v49  ;;  %4314 = vmatmul.mubr.msk.f32.gmra.mrb[28].mxu0 %vm201_vm1, %v5850_v32  ;;  %v6337_v49 = vld [vmem:[#allocation39_spill] sm:$0xff] }
 0x116   : > { %4095 = vmatprep.mubr.msk.f32.mxu1 %vm201_vm1, %v5138_v4  ;;  %4316 = vmatprep.mubr.msk.f32.mxu0 %vm201_vm1, %v2550_v56  ;;  %v6338_v4 = vld [vmem:[#allocation48_spill] sm:$0xff] }
 0x119   : > { %4096 = vmatmul.mubr.msk.f32.gmra.mrb[16].mxu1 %vm201_vm1, %v5140_v7  ;;  %4317 = vmatmul.mubr.msk.f32.gmra.mrb[30].mxu0 %vm201_vm1, %v2552_v33  ;;  %v6339_v7 = vld [vmem:[#allocation49_spill] sm:$0xff] }
 0x11a   : > { %4098 = vmatprep.mubr.msk.f32.mxu1 %vm201_vm1, %v5155_v16  ;;  %4321 = vmatprep.mubr.msk.f32.mxu0 %vm201_vm1, %v5222_v18  ;;  %v6340_v16 = vld [vmem:[#allocation50_spill] sm:$0xff]  ;;  %v2822_v18 = vrot.slane %v5839_v47, 2 }
 0x11d   : > { %4099 = vmatmul.mubr.msk.f32.gmra.mrb[18].mxu1 %vm201_vm1, %v5165_v24  ;;  %4322 = vmatmul.mubr.msk.f32.vlgmr.msra.gmra.mrb[0].mxu0 %vm201_vm1, %v6294_v9  ;;  %v2820_v24 = vrot.slane %v5711_v53, 2 }
 0x11e   : > { %4101 = vmatprep.mubr.msk.f32.mxu1 %vm201_vm1, %v5192_v59  ;;  %4324 = vmatprep.mubr.msk.f32.mxu0 %vm201_vm1, %v6295_v13  ;;  %v6341_v59 = vld [vmem:[#allocation51_spill] sm:$0xff] }
 0x121   : > { %4102 = vmatmul.mubr.msk.f32.gmra.mrb[20].mxu1 %vm201_vm1, %v5194_v61  ;;  %4325 = vmatmul.mubr.msk.f32.gmra.mrb[2].mxu0 %vm201_vm1, %v6296_v2  ;;  %v6342_v61 = vld [vmem:[#allocation52_spill] sm:$0xff] }
 0x122   : > { %4104 = vmatprep.mubr.msk.f32.mxu1 %vm201_vm1, %v5224_v21  ;;  %4327 = vmatprep.mubr.msk.f32.mxu0 %vm201_vm1, %v6297_v40 }
 0x125   : > { %4105 = vmatmul.mubr.msk.f32.gmra.mrb[22].mxu1 %vm201_vm1, %v5226_v25  ;;  %4328 = vmatmul.mubr.msk.f32.gmra.mrb[4].mxu0 %vm201_vm1, %v6298_v19  ;;  %v6343_v25 = vld [vmem:[#allocation53_spill] sm:$0xff] }
 0x126   : > { %4107 = vmatprep.mubr.msk.f32.mxu1 %vm201_vm1, %v5265_v14  ;;  %4330 = vmatprep.mubr.msk.f32.mxu0 %vm201_vm1, %v6299_v52  ;;  %v2823_v14 = vsel %vm1061_vm4, %v2820_v24, %v2822_v18 }
 0x129   : > { %4108 = vmatmul.mubr.msk.f32.gmra.mrb[24].mxu1 %vm201_vm1, %v5267_v17  ;;  %4331 = vmatmul.mubr.msk.f32.gmra.mrb[6].mxu0 %vm201_vm1, %v6300_v10  ;;  %v2819_v17 = vrot.slane %v5701_v31, 2 }
 0x12a   : > { %4110 = vmatprep.mubr.msk.f32.mxu1 %vm201_vm1, %v5297_v34  ;;  %4333 = vmatprep.mubr.msk.f32.mxu0 %vm201_vm1, %v6301_v45 }
 0x12b   : > { %v2821_v21 = vsel %vm1061_vm4, %v2819_v17, %v2820_v24 }
 0x12d   : > { %4111 = vmatmul.mubr.msk.f32.gmra.mrb[26].mxu1 %vm201_vm1, %v5299_v54  ;;  %4334 = vmatmul.mubr.msk.f32.gmra.mrb[8].mxu0 %vm201_vm1, %v5373_v30 }
 0x12e   : > { %4113 = vmatprep.mubr.msk.f32.mxu1 %vm201_vm1, %v5329_v28  ;;  %4336 = vmatprep.mubr.msk.f32.mxu0 %vm201_vm1, %v5381_v3 }
 0x131   : > { %4114 = vmatmul.mubr.msk.f32.gmra.mrb[28].mxu1 %vm201_vm1, %v5331_v27  ;;  %4337 = vmatmul.mubr.msk.f32.gmra.mrb[10].mxu0 %vm201_vm1, %v5397_v58 }
 0x132   : > { %4116 = vmatprep.mubr.msk.f32.mxu1 %vm201_vm1, %v5516_v36  ;;  %4339 = vmatprep.mubr.msk.f32.mxu0 %vm201_vm1, %v5401_v44  ;;  %v6335_v36 = vld [vmem:[#allocation37_spill] sm:$0xff] }
 0x135   : > { %4117 = vmatmul.mubr.msk.f32.gmra.mrb[30].mxu1 %vm201_vm1, %v5518_v35  ;;  %4340 = vmatmul.mubr.msk.f32.gmra.mrb[12].mxu0 %vm201_vm1, %v5414_v62  ;;  %v6334_v35 = vld [vmem:[#allocation44_spill] sm:$0xff] }
 0x136   : > { %4145 = vmatprep.mubr.msk.f32.mxu1 %vm201_vm1, %v6319_v22  ;;  %4342 = vmatprep.mubr.msk.f32.mxu0 %vm201_vm1, %v5418_v38 }
 0x139   : > { %4146 = vmatmul.mubr.msk.f32.vlgmr.msra.gmra.mrb[16].mxu1 %vm201_vm1, %v6321_v60  ;;  %4343 = vmatmul.mubr.msk.f32.gmra.mrb[14].mxu0 %vm201_vm1, %v5436_v23 }
 0x13a   : > { %4148 = vmatprep.mubr.msk.f32.mxu1 %vm201_vm1, %v6322_v5  ;;  %4345 = vmatprep.mubr.msk.f32.mxu0 %vm201_vm1, %v5442_v63 }
 0x13d   : > { %4149 = vmatmul.mubr.msk.f32.gmra.mrb[18].mxu1 %vm201_vm1, %v6323_v15  ;;  %4346 = vmatmul.mubr.msk.f32.gmra.mrb[16].mxu0 %vm201_vm1, %v5457_v20 }
 0x13e   : > { %4151 = vmatprep.mubr.msk.f32.mxu1 %vm201_vm1, %v6324_v43  ;;  %4348 = vmatprep.mubr.msk.f32.mxu0 %vm201_vm1, %v6334_v35 }
 0x141   : > { %4152 = vmatmul.mubr.msk.f32.gmra.mrb[20].mxu1 %vm201_vm1, %v6325_v41  ;;  %4349 = vmatmul.mubr.msk.f32.gmra.mrb[18].mxu0 %vm201_vm1, %v5474_v39 }
 0x142   : > { %4154 = vmatprep.mubr.msk.f32.mxu1 %vm201_vm1, %v6326_v6  ;;  %4351 = vmatprep.mubr.msk.f32.mxu0 %vm201_vm1, %v5478_v37 }
 0x145   : > { %4155 = vmatmul.mubr.msk.f32.gmra.mrb[22].mxu1 %vm201_vm1, %v6327_v42  ;;  %4352 = vmatmul.mubr.msk.f32.gmra.mrb[20].mxu0 %vm201_vm1, %v6309_v8 }
 0x146   : > { %4157 = vmatprep.mubr.msk.f32.mxu1 %vm201_vm1, %v6328_v46  ;;  %4354 = vmatprep.mubr.msk.f32.mxu0 %vm201_vm1, %v6311_v29 }
 0x149   : > { %4158 = vmatmul.mubr.msk.f32.gmra.mrb[24].mxu1 %vm201_vm1, %v6335_v36  ;;  %4355 = vmatmul.mubr.msk.f32.gmra.mrb[22].mxu0 %vm201_vm1, %v6336_v48 }
 0x14a   : > { %4160 = vmatprep.mubr.msk.f32.mxu1 %vm201_vm1, %v6337_v49  ;;  %4357 = vmatprep.mubr.msk.f32.mxu0 %vm201_vm1, %v6338_v4 }
 0x14d   : > { %4161 = vmatmul.mubr.msk.f32.gmra.mrb[26].mxu1 %vm201_vm1, %v6331_v0  ;;  %4358 = vmatmul.mubr.msk.f32.gmra.mrb[24].mxu0 %vm201_vm1, %v6339_v7 }
 0x14e   : > { %4163 = vmatprep.mubr.msk.f32.mxu1 %vm201_vm1, %v6332_v1  ;;  %4360 = vmatprep.mubr.msk.f32.mxu0 %vm201_vm1, %v6340_v16 }
 0x151   : > { %4164 = vmatmul.mubr.msk.f32.gmra.mrb[28].mxu1 %vm201_vm1, %v6333_v12  ;;  %4361 = vmatmul.mubr.msk.f32.gmra.mrb[26].mxu0 %vm201_vm1, %v6341_v59 }
 0x152   : > { %4166 = vmatprep.mubr.msk.f32.mxu1 %vm201_vm1, %v5837_v50  ;;  %4363 = vmatprep.mubr.msk.f32.mxu0 %vm201_vm1, %v6342_v61 }
 0x155   : > { %4167 = vmatmul.mubr.msk.f32.gmra.mrb[30].mxu1 %vm201_vm1, %v5850_v32  ;;  %4364 = vmatmul.mubr.msk.f32.gmra.mrb[28].mxu0 %vm201_vm1, %v6343_v25 }
 0x156   : > { %4366 = vmatprep.mubr.msk.f32.mxu0 %vm201_vm1, %v2821_v21 }
 0x159   : > { %4367 = vmatmul.mubr.msk.f32.gmra.mrb[30].mxu0 %vm201_vm1, %v2823_v14 }
 0x1cc   : > { %v4073_v34 = vpop.f32.mrb[0].mxu1 }
 0x1cd   : > { %v1545_v54 = vpop.f32.mrb[1].mxu1 }
 0x1d0   : > { %v4076_v28 = vpop.f32.mrb[2].mxu1 }
 0x1d1   : > { %v1555_v27 = vpop.f32.mrb[3].mxu1 }
 0x1d4   : > { %v4079_v3 = vpop.f32.mrb[4].mxu1 }
 0x1d5   : > { %v1565_v30 = vpop.f32.mrb[5].mxu1 }
 0x1d8   : > { %v4082_v58 = vpop.f32.mrb[6].mxu1 }
 0x1d9   : > { %v1575_v44 = vpop.f32.mrb[7].mxu1 }
 0x1dc   : > { %v4085_v62 = vpop.f32.mrb[8].mxu1 }
 0x1dd   : > { %v1585_v38 = vpop.f32.mrb[9].mxu1 }
 0x1e0   : > { %v5992_v23 = vpop.f32.mrb[10].mxu1 }
 0x1e1   : > { %v5994_v63 = vpop.f32.mrb[11].mxu1 }
 0x1e4   : > { %v5996_v20 = vpop.f32.mrb[12].mxu1 }
 0x1e5   : > { %v5998_v29 = vpop.f32.mrb[13].mxu1 }
 0x1e8   : > { %v6000_v39 = vpop.f32.mrb[14].mxu1 }
 0x1e9   : > { %v6002_v37 = vpop.f32.mrb[15].mxu1 }
 0x1f0   : > { %v4323_v50 = vpop.f32.mrb[0].mxu0 }
 0x1f1   : > { %v4371_v57 = vadd.f32 %v4323_v50, %v4073_v34  ;;  %v2899_v9 = vpop.f32.mrb[1].mxu0 }
 0x1f2   : > { %v4372_v13 = vadd.f32 %v2899_v9, %v1545_v54 }
 0x1f3   : > { %v3098_v2 = vadd.f32 %v4371_v57, %v6008_v26 }
 0x1f4   : > { %v3097_v40 = vadd.f32 %v4372_v13, %v6008_v26  ;;  %v4326_v19 = vpop.f32.mrb[2].mxu0 }
 0x1f5   : > { %v3130_v52 = vmul.f32 0.2, %v3098_v2  ;;  %v4373_v10 = vadd.f32 %v4326_v19, %v4076_v28  ;;  %v2909_v45 = vpop.f32.mrb[3].mxu0 }
 0x1f6   : > { %v3129_v31 = vmul.f32 0.2, %v3097_v40  ;;  %v4374_v53 = vadd.f32 %v2909_v45, %v1555_v27 }
 0x1f7   : > { %v3162_v8 = vmax.f32 %v3098_v2, %v3130_v52  ;;  %v3100_v22 = vadd.f32 %v4373_v10, %v6008_v26 }
 0x1f8   : > { %v3161_v60 = vmax.f32 %v3097_v40, %v3129_v31  ;;  %v3099_v5 = vadd.f32 %v4374_v53, %v6008_v26  ;;  %v4329_v15 = vpop.f32.mrb[4].mxu0 }
 0x1f9   : > { %3195 = vst.msk [vmem:[%s6016_s8 + $0x8] sm:$0xff] %vm3193_vm5, %v3162_v8  ;;  %v3132_v43 = vmul.f32 0.2, %v3100_v22  ;;  %v4375_v41 = vadd.f32 %v4329_v15, %v4079_v3  ;;  %v2919_v6 = vpop.f32.mrb[5].mxu0 }
 0x1fa   : > { %3194 = vst.msk [vmem:[%s6016_s8] sm:$0xff] %vm3193_vm5, %v3161_v60  ;;  %v3131_v42 = vmul.f32 0.2, %v3099_v5  ;;  %v4376_v46 = vadd.f32 %v2919_v6, %v1565_v30 }
 0x1fb   : > { %v3164_v47 = vmax.f32 %v3100_v22, %v3132_v43  ;;  %v3102_v55 = vadd.f32 %v4375_v41, %v6008_v26 }
 0x1fc   : > { %v3163_v0 = vmax.f32 %v3099_v5, %v3131_v42  ;;  %v3101_v1 = vadd.f32 %v4376_v46, %v6008_v26  ;;  %v4332_v11 = vpop.f32.mrb[6].mxu0 }
 0x1fd   : > { %3197 = vst.msk [vmem:[%s6016_s8 + $0x18] sm:$0xff] %vm3193_vm5, %v3164_v47  ;;  %v3134_v12 = vmul.f32 0.2, %v3102_v55  ;;  %v4377_v32 = vadd.f32 %v4332_v11, %v4082_v58  ;;  %v2929_v51 = vpop.f32.mrb[7].mxu0 }
 0x1fe   : > { %3196 = vst.msk [vmem:[%s6016_s8 + $0x10] sm:$0xff] %vm3193_vm5, %v3163_v0  ;;  %v3133_v56 = vmul.f32 0.2, %v3101_v1  ;;  %v4378_v33 = vadd.f32 %v2929_v51, %v1575_v44 }
 0x1ff   : > { %v3166_v35 = vmax.f32 %v3102_v55, %v3134_v12  ;;  %v3104_v36 = vadd.f32 %v4377_v32, %v6008_v26 }
 0x200   : > { %v3165_v48 = vmax.f32 %v3101_v1, %v3133_v56  ;;  %v3103_v49 = vadd.f32 %v4378_v33, %v6008_v26  ;;  %v4335_v4 = vpop.f32.mrb[8].mxu0 }
 0x201   : > { %3199 = vst.msk [vmem:[%s6016_s8 + $0x28] sm:$0xff] %vm3193_vm5, %v3166_v35  ;;  %v3136_v7 = vmul.f32 0.2, %v3104_v36  ;;  %v4379_v16 = vadd.f32 %v4335_v4, %v4085_v62  ;;  %v2939_v17 = vpop.f32.mrb[9].mxu0 }
 0x202   : > { %3198 = vst.msk [vmem:[%s6016_s8 + $0x20] sm:$0xff] %vm3193_vm5, %v3165_v48  ;;  %v3135_v24 = vmul.f32 0.2, %v3103_v49  ;;  %v4380_v59 = vadd.f32 %v2939_v17, %v1585_v38 }
 0x203   : > { %v3168_v61 = vmax.f32 %v3104_v36, %v3136_v7  ;;  %v3106_v18 = vadd.f32 %v4379_v16, %v6008_v26 }
 0x204   : > { %v3167_v21 = vmax.f32 %v3103_v49, %v3135_v24  ;;  %v3105_v25 = vadd.f32 %v4380_v59, %v6008_v26  ;;  %v4338_v14 = vpop.f32.mrb[10].mxu0 }
 0x205   : > { %3201 = vst.msk [vmem:[%s6016_s8 + $0x38] sm:$0xff] %vm3193_vm5, %v3168_v61  ;;  %v3138_v34 = vmul.f32 0.2, %v3106_v18  ;;  %v4381_v54 = vadd.f32 %v4338_v14, %v5992_v23  ;;  %v2949_v28 = vpop.f32.mrb[11].mxu0 }
 0x206   : > { %3200 = vst.msk [vmem:[%s6016_s8 + $0x30] sm:$0xff] %vm3193_vm5, %v3167_v21  ;;  %v3137_v27 = vmul.f32 0.2, %v3105_v25  ;;  %v4382_v3 = vadd.f32 %v2949_v28, %v5994_v63 }
 0x207   : > { %v3170_v30 = vmax.f32 %v3106_v18, %v3138_v34  ;;  %v3108_v58 = vadd.f32 %v4381_v54, %v6008_v26 }
 0x208   : > { %v3169_v44 = vmax.f32 %v3105_v25, %v3137_v27  ;;  %v3107_v62 = vadd.f32 %v4382_v3, %v6008_v26  ;;  %v4341_v38 = vpop.f32.mrb[12].mxu0 }
 0x209   : > { %3203 = vst.msk [vmem:[%s6016_s8 + $0x48] sm:$0xff] %vm3193_vm5, %v3170_v30  ;;  %v3140_v50 = vmul.f32 0.2, %v3108_v58  ;;  %v4383_v57 = vadd.f32 %v4341_v38, %v5996_v20  ;;  %v2959_v23 = vpop.f32.mrb[13].mxu0 }
 0x20a   : > { %3202 = vst.msk [vmem:[%s6016_s8 + $0x40] sm:$0xff] %vm3193_vm5, %v3169_v44  ;;  %v3139_v9 = vmul.f32 0.2, %v3107_v62  ;;  %v4384_v63 = vadd.f32 %v2959_v23, %v5998_v29 }
 0x20b   : > { %v3172_v13 = vmax.f32 %v3108_v58, %v3140_v50  ;;  %v3110_v2 = vadd.f32 %v4383_v57, %v6008_v26 }
 0x20c   : > { %v3171_v40 = vmax.f32 %v3107_v62, %v3139_v9  ;;  %v3109_v19 = vadd.f32 %v4384_v63, %v6008_v26  ;;  %v4147_v52 = vpop.f32.mrb[16].mxu1  ;;  %v4344_v10 = vpop.f32.mrb[14].mxu0 }
 0x20d   : > { %3205 = vst.msk [vmem:[%s6016_s8 + $0x58] sm:$0xff] %vm3193_vm5, %v3172_v13  ;;  %v3142_v45 = vmul.f32 0.2, %v3110_v2  ;;  %v4385_v20 = vadd.f32 %v4344_v10, %v6000_v39  ;;  %v1897_v31 = vpop.f32.mrb[17].mxu1  ;;  %v2969_v53 = vpop.f32.mrb[15].mxu0 }
 0x20e   : > { %3204 = vst.msk [vmem:[%s6016_s8 + $0x50] sm:$0xff] %vm3193_vm5, %v3171_v40  ;;  %v3141_v29 = vmul.f32 0.2, %v3109_v19  ;;  %v4386_v8 = vadd.f32 %v2969_v53, %v6002_v37 }
 0x20f   : > { %v3174_v22 = vmax.f32 %v3110_v2, %v3142_v45  ;;  %v3112_v60 = vadd.f32 %v4385_v20, %v6008_v26 }
 0x210   : > { %v3173_v5 = vmax.f32 %v3109_v19, %v3141_v29  ;;  %v3111_v15 = vadd.f32 %v4386_v8, %v6008_v26  ;;  %v4150_v43 = vpop.f32.mrb[18].mxu1  ;;  %v4347_v41 = vpop.f32.mrb[16].mxu0 }
 0x211   : > { %3207 = vst.msk [vmem:[%s6016_s8 + $0x68] sm:$0xff] %vm3193_vm5, %v3174_v22  ;;  %v3144_v39 = vmul.f32 0.2, %v3112_v60  ;;  %v4387_v6 = vadd.f32 %v4347_v41, %v4147_v52  ;;  %v1907_v42 = vpop.f32.mrb[19].mxu1  ;;  %v2979_v46 = vpop.f32.mrb[17].mxu0 }
 0x212   : > { %3206 = vst.msk [vmem:[%s6016_s8 + $0x60] sm:$0xff] %vm3193_vm5, %v3173_v5  ;;  %v3143_v47 = vmul.f32 0.2, %v3111_v15  ;;  %v4388_v37 = vadd.f32 %v2979_v46, %v1897_v31 }
 0x213   : > { %v3176_v55 = vmax.f32 %v3112_v60, %v3144_v39  ;;  %v3114_v0 = vadd.f32 %v4387_v6, %v6008_v26 }
 0x214   : > { %v3175_v1 = vmax.f32 %v3111_v15, %v3143_v47  ;;  %v3113_v11 = vadd.f32 %v4388_v37, %v6008_v26  ;;  %v4153_v12 = vpop.f32.mrb[20].mxu1  ;;  %v4350_v32 = vpop.f32.mrb[18].mxu0 }
 0x215   : > { %3209 = vst.msk [vmem:[%s6016_s8 + $0x78] sm:$0xff] %vm3193_vm5, %v3176_v55  ;;  %v3146_v51 = vmul.f32 0.2, %v3114_v0  ;;  %v4389_v56 = vadd.f32 %v4350_v32, %v4150_v43  ;;  %v1917_v33 = vpop.f32.mrb[21].mxu1  ;;  %v2989_v35 = vpop.f32.mrb[19].mxu0 }
 0x216   : > { %3208 = vst.msk [vmem:[%s6016_s8 + $0x70] sm:$0xff] %vm3193_vm5, %v3175_v1  ;;  %v3145_v36 = vmul.f32 0.2, %v3113_v11  ;;  %v4390_v48 = vadd.f32 %v2989_v35, %v1907_v42 }
 0x217   : > { %v3178_v49 = vmax.f32 %v3114_v0, %v3146_v51  ;;  %v3116_v4 = vadd.f32 %v4389_v56, %v6008_v26 }
 0x218   : > { %v3177_v7 = vmax.f32 %v3113_v11, %v3145_v36  ;;  %v3115_v16 = vadd.f32 %v4390_v48, %v6008_v26  ;;  %v4156_v17 = vpop.f32.mrb[22].mxu1  ;;  %v4353_v24 = vpop.f32.mrb[20].mxu0 }
 0x219   : > { %3211 = vst.msk [vmem:[%s6016_s8 + $0x88] sm:$0xff] %vm3193_vm5, %v3178_v49  ;;  %v3148_v59 = vmul.f32 0.2, %v3116_v4  ;;  %v4391_v61 = vadd.f32 %v4353_v24, %v4153_v12  ;;  %v1927_v18 = vpop.f32.mrb[23].mxu1  ;;  %v2999_v21 = vpop.f32.mrb[21].mxu0 }
 0x21a   : > { %3210 = vst.msk [vmem:[%s6016_s8 + $0x80] sm:$0xff] %vm3193_vm5, %v3177_v7  ;;  %v3147_v25 = vmul.f32 0.2, %v3115_v16  ;;  %v4392_v14 = vadd.f32 %v2999_v21, %v1917_v33 }
 0x21b   : > { %v3180_v34 = vmax.f32 %v3116_v4, %v3148_v59  ;;  %v3118_v54 = vadd.f32 %v4391_v61, %v6008_v26 }
 0x21c   : > { %v3179_v28 = vmax.f32 %v3115_v16, %v3147_v25  ;;  %v3117_v27 = vadd.f32 %v4392_v14, %v6008_v26  ;;  %v4159_v3 = vpop.f32.mrb[24].mxu1  ;;  %v4356_v30 = vpop.f32.mrb[22].mxu0 }
 0x21d   : > { %3213 = vst.msk [vmem:[%s6016_s8 + $0x98] sm:$0xff] %vm3193_vm5, %v3180_v34  ;;  %v3150_v58 = vmul.f32 0.2, %v3118_v54  ;;  %v4393_v44 = vadd.f32 %v4356_v30, %v4156_v17  ;;  %v1937_v62 = vpop.f32.mrb[25].mxu1  ;;  %v3009_v38 = vpop.f32.mrb[23].mxu0 }
 0x21e   : > { %3212 = vst.msk [vmem:[%s6016_s8 + $0x90] sm:$0xff] %vm3193_vm5, %v3179_v28  ;;  %v3149_v50 = vmul.f32 0.2, %v3117_v27  ;;  %v4394_v57 = vadd.f32 %v3009_v38, %v1927_v18 }
 0x21f   : > { %v3182_v23 = vmax.f32 %v3118_v54, %v3150_v58  ;;  %v3120_v9 = vadd.f32 %v4393_v44, %v6008_v26 }
 0x220   : > { %v3181_v63 = vmax.f32 %v3117_v27, %v3149_v50  ;;  %v3119_v13 = vadd.f32 %v4394_v57, %v6008_v26  ;;  %v4162_v2 = vpop.f32.mrb[26].mxu1  ;;  %v4359_v40 = vpop.f32.mrb[24].mxu0 }
 0x221   : > { %3215 = vst.msk [vmem:[%s6016_s8 + $0xa8] sm:$0xff] %vm3193_vm5, %v3182_v23  ;;  %v3152_v19 = vmul.f32 0.2, %v3120_v9  ;;  %v4395_v52 = vadd.f32 %v4359_v40, %v4159_v3  ;;  %v1947_v10 = vpop.f32.mrb[27].mxu1  ;;  %v3019_v45 = vpop.f32.mrb[25].mxu0 }
 0x222   : > { %3214 = vst.msk [vmem:[%s6016_s8 + $0xa0] sm:$0xff] %vm3193_vm5, %v3181_v63  ;;  %v3151_v20 = vmul.f32 0.2, %v3119_v13  ;;  %v4396_v31 = vadd.f32 %v3019_v45, %v1937_v62 }
 0x223   : > { %v3184_v53 = vmax.f32 %v3120_v9, %v3152_v19  ;;  %v3122_v29 = vadd.f32 %v4395_v52, %v6008_v26 }
 0x224   : > { %v3183_v8 = vmax.f32 %v3119_v13, %v3151_v20  ;;  %v3121_v22 = vadd.f32 %v4396_v31, %v6008_v26  ;;  %v4165_v60 = vpop.f32.mrb[28].mxu1  ;;  %v4362_v5 = vpop.f32.mrb[26].mxu0 }
 0x225   : > { %3217 = vst.msk [vmem:[%s6016_s8 + $0xb8] sm:$0xff] %vm3193_vm5, %v3184_v53  ;;  %v3154_v15 = vmul.f32 0.2, %v3122_v29  ;;  %v4397_v43 = vadd.f32 %v4362_v5, %v4162_v2  ;;  %v1957_v41 = vpop.f32.mrb[29].mxu1  ;;  %v3029_v39 = vpop.f32.mrb[27].mxu0 }
 0x226   : > { %3216 = vst.msk [vmem:[%s6016_s8 + $0xb0] sm:$0xff] %vm3193_vm5, %v3183_v8  ;;  %v3153_v6 = vmul.f32 0.2, %v3121_v22  ;;  %v4398_v42 = vadd.f32 %v3029_v39, %v1947_v10 }
 0x227   : > { %v3186_v46 = vmax.f32 %v3122_v29, %v3154_v15  ;;  %v3124_v47 = vadd.f32 %v4397_v43, %v6008_v26 }
 0x228   : > { %v3185_v37 = vmax.f32 %v3121_v22, %v3153_v6  ;;  %v3123_v55 = vadd.f32 %v4398_v42, %v6008_v26  ;;  %v4168_v0 = vpop.f32.mrb[30].mxu1  ;;  %v4365_v1 = vpop.f32.mrb[28].mxu0 }
 0x229   : > { %3219 = vst.msk [vmem:[%s6016_s8 + $0xc8] sm:$0xff] %vm3193_vm5, %v3186_v46  ;;  %v3156_v11 = vmul.f32 0.2, %v3124_v47  ;;  %v4399_v12 = vadd.f32 %v4365_v1, %v4165_v60  ;;  %v1967_v32 = vpop.f32.mrb[31].mxu1  ;;  %v3039_v51 = vpop.f32.mrb[29].mxu0 }
 0x22a   : > { %3218 = vst.msk [vmem:[%s6016_s8 + $0xc0] sm:$0xff] %vm3193_vm5, %v3185_v37  ;;  %v3155_v56 = vmul.f32 0.2, %v3123_v55  ;;  %v4400_v33 = vadd.f32 %v3039_v51, %v1957_v41 }
 0x22b   : > { %v3188_v35 = vmax.f32 %v3124_v47, %v3156_v11  ;;  %v3126_v36 = vadd.f32 %v4399_v12, %v6008_v26 }
 0x22c   : > { %v3187_v48 = vmax.f32 %v3123_v55, %v3155_v56  ;;  %v3125_v49 = vadd.f32 %v4400_v33, %v6008_v26  ;;  %v4368_v4 = vpop.f32.mrb[30].mxu0 }
 0x22d   : > { %3221 = vst.msk [vmem:[%s6016_s8 + $0xd8] sm:$0xff] %vm3193_vm5, %v3188_v35  ;;  %v3158_v7 = vmul.f32 0.2, %v3126_v36  ;;  %v4401_v16 = vadd.f32 %v4368_v4, %v4168_v0  ;;  %v3049_v17 = vpop.f32.mrb[31].mxu0 }
 0x22e   : > { %3220 = vst.msk [vmem:[%s6016_s8 + $0xd0] sm:$0xff] %vm3193_vm5, %v3187_v48  ;;  %v3157_v24 = vmul.f32 0.2, %v3125_v49  ;;  %v4402_v59 = vadd.f32 %v3049_v17, %v1967_v32 }
 0x22f   : > { %v3190_v61 = vmax.f32 %v3126_v36, %v3158_v7  ;;  %v3128_v18 = vadd.f32 %v4401_v16, %v6008_v26 }
 0x230   : > { %v3189_v21 = vmax.f32 %v3125_v49, %v3157_v24  ;;  %v3127_v25 = vadd.f32 %v4402_v59, %v6008_v26 }
 0x231   : > { %3223 = vst.msk [vmem:[%s6016_s8 + $0xe8] sm:$0xff] %vm3193_vm5, %v3190_v61  ;;  %v3160_v14 = vmul.f32 0.2, %v3128_v18 }
 0x232   : > { %3222 = vst.msk [vmem:[%s6016_s8 + $0xe0] sm:$0xff] %vm3193_vm5, %v3189_v21  ;;  %v3159_v34 = vmul.f32 0.2, %v3127_v25 }
 0x233   : > { %v3192_v54 = vmax.f32 %v3128_v18, %v3160_v14 }
 0x234   : > { %v3191_v26 = vmax.f32 %v3127_v25, %v3159_v34 }
 0x235   : > { %3225 = vst.msk [vmem:[%s6016_s8 + $0xf8] sm:$0xff] %vm3193_vm5, %v3192_v54 }
 0x236   : > { %3224 = vst.msk [vmem:[%s6016_s8 + $0xf0] sm:$0xff] %vm3193_vm5, %v3191_v26 }
 0x237   : > { %4683 = shalt.err (!%p4680_p3)
}
 0x238   : > { %s4684_s27 = scalar_lea.hbm %s6117_s19, 4096  ;;  %s4688_s30 = scalar_lea.hbm %s6171_s3, 8192 }
 0x239   : > { %p4685_p4 = scmp.ne.s32.totalorder %s6117_s19, %s4684_s27  ;;  %p4689_p9 = scmp.lt.u32.totalorder %s6117_s19, %s6171_s3 }
 0x23a   : > { %p4690_p10 = scmp.lt.u32.totalorder %s4688_s30, %s4684_s27  ;;  %p4692_p12 = scmp.lt.u32.totalorder %s4684_s27, %s6117_s19 }
 0x23b   : > { %p4686_p7 = pnand %p4685_p4, %p4796_p5 }
 0x23c   : > { %p4691_p11 = por %p4690_p10, %p4689_p9 }
 0x23d   : > { %p4687_p8 = pneg %p4686_p7 }
 0x23e   : > { %p4693_p13 = por %p4692_p12, %p4691_p11 }
 0x240   : > { %p4694_p0 = pnand %p4693_p13, %p4687_p8 }
 0x242   : > { %4697 = shalt.err (!%p4694_p0)
}
 0x243   : > { %s4736_s6 = smov 128   ;;  %s4737_s7 = smov 8  }
 0x244   : > { %4627 = dma.vmem_to_hbm [thread:$0]  (%p4796_p5), %s6119_s10, 4096, %s6117_s19, %s6127_s16, %s4736_s6, %s4736_s6, %s4737_s7  }
 0x245 PF: > { %p4633_p1 = scmp.ge.s32.totalorder %s4732_s15, 2  ;;  %s3255_s8 = sand.u32 1, %s4720_s12  }
 0x246   : > { %s3256_s9 = scalar_lea.sflag [#allocation4], %s3255_s8 }
 0x247   : > { %p4630_p2 = pnand %p4633_p1, %p4800_p6 }
 0x249   : > { %4715 = dma.done.wait (!%p4630_p2), %s3256_s9, 4096  }
 0x24a   : > { %4717 = vsyncadd (!%p4630_p2), %s3256_s9, 4294963200  ;;  %p13_p3 = scmp.ge.s32.totalorder %s4783_s18, 4   ;;  %s6344_s12 = smov %s4724_s13 }
 0x24b   : > { %s6345_s13 = smov %s4728_s14  ;;  %s6346_s14 = smov %s4794_s21 }
 0x24c   : > { %s6347_s15 = smov %s4783_s18  ;;  %15 = sbr.rel (!%p13_p3) target bundleno = 3 (0x3), region = 76 }
 0x253   :  { %3261 = vsyncpa [#allocation4], 1 }
 0x254   :  { %3263 = vsyncpa [#allocation4 + $0x1], 1 }

</bundles_post_ra>
